<compile_context>
chip_gen: v5e
topology: v5e:2x2
jax: 0.10.0
libtpu: 0.0.40
codegen_flags: <defaults>
</compile_context>

<pallas_src>
import jax
import jax.numpy as jnp
from jax import lax
from jax.experimental import pallas as pl
from jax.experimental.pallas import tpu as pltpu


def _down_sampling_kernel(xee_ref, xeo_ref, xoe_ref, xoo_ref,
                          w_ref, bconv_ref, smp_ref, bmp_ref, o_ref):
    # parity planes: (NB, Ho, Wo, Cin) f32
    NB, Ho, Wo, Cin = xee_ref.shape
    Cconv = w_ref.shape[1]
    M = NB * Ho * Wo

    x_ee = xee_ref[...]
    x_eo = xeo_ref[...]
    x_oe = xoe_ref[...]
    x_oo = xoo_ref[...]

    def shift_w(a):  # out[:, :, j, :] = a[:, :, j-1, :], zero at j == 0 (left pad)
        return jnp.concatenate(
            [jnp.zeros_like(a[:, :, :1, :]), a[:, :, :-1, :]], axis=2)

    def shift_h(a):  # out[:, i, :, :] = a[:, i-1, :, :], zero at i == 0 (top pad)
        return jnp.concatenate(
            [jnp.zeros_like(a[:, :1]), a[:, :-1]], axis=1)

    a10 = shift_w(x_eo)    # tap (ky=1, kx=0)
    a20 = shift_w(x_oo)    # tap (2, 0)
    a01 = shift_h(x_oe)    # tap (0, 1)
    a02 = shift_h(x_oo)    # tap (0, 2)
    a00 = shift_h(a20)     # tap (0, 0)

    # Lane-concat the 9 taps -> one MXU matmul (BN scale already in the weights).
    taps = jnp.concatenate(
        [x_ee, x_eo, a10, x_oe, x_oo, a20, a01, a02, a00], axis=-1)  # (NB,Ho,Wo,9*Cin)
    taps2d = taps.reshape(M, 9 * Cin).astype(jnp.bfloat16)           # leading-dim merge only

    conv = jnp.dot(taps2d, w_ref[...], preferred_element_type=jnp.float32)
    conv = conv + bconv_ref[...]                                     # (M, Cconv)

    # MaxPool 2x2 stride 2 == elementwise max of the four parity planes (f32 exact).
    mp = jnp.maximum(jnp.maximum(x_ee, x_eo), jnp.maximum(x_oe, x_oo))
    mp = mp.reshape(M, Cin) * smp_ref[...] + bmp_ref[...]            # (M, Cin)

    out = jnp.maximum(jnp.concatenate([conv, mp], axis=-1), 0.0)     # (M, Cout)
    o_ref[...] = out.reshape(NB, Ho, Wo, Cconv + Cin).astype(o_ref.dtype)


def _pick_batch_block(N, Ho, Wo, Cin, Cout, vmem_budget_bytes=8 * 1024 * 1024):
    """Largest NB dividing N whose double-buffered working set fits the budget."""
    per_batch = (4 * Ho * Wo * Cin * 4      # four f32 parity planes
                 + Ho * Wo * Cout * 4)      # f32 output tile
    per_batch *= 2                          # double buffering
    nb = max(1, min(N, vmem_budget_bytes // max(per_batch, 1)))
    while N % nb:
        nb -= 1
    return nb


def down_sampling_forward(x, w, gamma, beta, mean, var, eps=1e-3):
    """x: (N, H, W, Cin) f32 NHWC.  w: (3, 3, Cin, Cconv) HWIO (Cconv = oupc - inpc).
    Returns (N, H//2, W//2, Cconv + Cin)."""
    N, H, W, Cin = x.shape
    Cconv = w.shape[-1]
    Cout = Cconv + Cin
    assert H % 2 == 0 and W % 2 == 0, "even spatial dims assumed (stride-2 block)"
    Ho, Wo = H // 2, W // 2

    # Fold BN (inference): scale into conv weights, keep only biases / mp affine.
    scale = gamma / jnp.sqrt(var + eps)
    bias = beta - mean * scale
    s_conv, s_mp = scale[:Cconv], scale[Cconv:]
    b_conv, b_mp = bias[:Cconv], bias[Cconv:]

    w_f = w * s_conv                                   # (3, 3, Cin, Cconv)
    tap_order = [(1, 1), (1, 2), (1, 0),               # must match kernel concat order
                 (2, 1), (2, 2), (2, 0),
                 (0, 1), (0, 2), (0, 0)]
    w_all = jnp.concatenate([w_f[ky, kx] for ky, kx in tap_order],
                            axis=0).astype(jnp.bfloat16)   # (9*Cin, Cconv)

    # Wrapper-side layout plumbing: spatial-parity decomposition (no stride-2
    # slicing inside the kernel).
    x_ee = x[:, 0::2, 0::2, :]
    x_eo = x[:, 0::2, 1::2, :]
    x_oe = x[:, 1::2, 0::2, :]
    x_oo = x[:, 1::2, 1::2, :]

    NB = _pick_batch_block(N, Ho, Wo, Cin, Cout)
    grid = (N // NB,)

    plane_spec = pl.BlockSpec((NB, Ho, Wo, Cin), lambda n: (n, 0, 0, 0))
    grid_spec = pltpu.PrefetchScalarGridSpec(
        num_scalar_prefetch=0,
        grid=grid,
        in_specs=[
            plane_spec, plane_spec, plane_spec, plane_spec,          # parity planes
            pl.BlockSpec((9 * Cin, Cconv), lambda n: (0, 0)),        # folded weights (bf16)
            pl.BlockSpec((1, Cconv), lambda n: (0, 0)),              # conv-branch bias
            pl.BlockSpec((1, Cin), lambda n: (0, 0)),                # mp-branch scale
            pl.BlockSpec((1, Cin), lambda n: (0, 0)),                # mp-branch bias
        ],
        out_specs=pl.BlockSpec((NB, Ho, Wo, Cout), lambda n: (n, 0, 0, 0)),
    )

    return pl.pallas_call(
        _down_sampling_kernel,
        out_shape=jax.ShapeDtypeStruct((N, Ho, Wo, Cout), x.dtype),
        grid_spec=grid_spec,
        compiler_params=pltpu.CompilerParams(
            dimension_semantics=("parallel",)),        # batch-block axis has no carry
    )(x_ee, x_eo, x_oe, x_oo, w_all,
      b_conv.reshape(1, Cconv), s_mp.reshape(1, Cin), b_mp.reshape(1, Cin))


# ---------------------------- pure-JAX reference ----------------------------

def ref_forward(x, w, gamma, beta, mean, var, eps=1e-3, quantize_conv=False):
    """NHWC reference of down_sampling_block (eval-mode BN).  With
    quantize_conv=True the conv inputs/weights are rounded to bf16 the same way
    the kernel does, so the comparison isolates kernel logic."""
    Cconv = w.shape[-1]
    dn = ("NHWC", "HWIO", "NHWC")
    scale = gamma / jnp.sqrt(var + eps)
    bias = beta - mean * scale
    if quantize_conv:
        xc = x.astype(jnp.bfloat16).astype(jnp.float32)
        wc = (w * scale[:Cconv]).astype(jnp.bfloat16).astype(jnp.float32)
        conv = lax.conv_general_dilated(xc, wc, (2, 2), ((1, 1), (1, 1)),
                                        dimension_numbers=dn,
                                        precision=lax.Precision.HIGHEST)
        conv = conv + bias[:Cconv]
    else:
        conv = lax.conv_general_dilated(x, w, (2, 2), ((1, 1), (1, 1)),
                                        dimension_numbers=dn,
                                        precision=lax.Precision.HIGHEST)
        conv = conv * scale[:Cconv] + bias[:Cconv]
    mp = lax.reduce_window(x, -jnp.inf, lax.max, (1, 2, 2, 1), (1, 2, 2, 1), "VALID")
    mp = mp * scale[Cconv:] + bias[Cconv:]
    return jnp.maximum(jnp.concatenate([conv, mp], axis=-1), 0.0)


if __name__ == "__main__":
    # inpc=16, oupc=32  -> conv branch has 16 channels, output has 32 channels.
    N, H, W, Cin, Cout = 2, 16, 16, 16, 32
    Cconv = Cout - Cin

    key = jax.random.PRNGKey(0)
    kx, kw, kg, kb, km, kv = jax.random.split(key, 6)
    x = jax.random.normal(kx, (N, H, W, Cin), jnp.float32)
    w = 0.1 * jax.random.normal(kw, (3, 3, Cin, Cconv), jnp.float32)
    gamma = 0.5 + jax.random.uniform(kg, (Cout,), jnp.float32)
    beta = 0.1 * jax.random.normal(kb, (Cout,), jnp.float32)
    mean = 0.1 * jax.random.normal(km, (Cout,), jnp.float32)
    var = 0.5 + jax.random.uniform(kv, (Cout,), jnp.float32)

    out = down_sampling_forward(x, w, gamma, beta, mean, var)
    out = jax.block_until_ready(out)
    assert out.shape == (N, H // 2, W // 2, Cout)

    # Tight check vs bf16-consistent reference (same conv-input rounding as kernel).
    ref_q = ref_forward(x, w, gamma, beta, mean, var, quantize_conv=True)
    assert jnp.max(jnp.abs(out - ref_q)) < 1e-3, "mismatch vs bf16-consistent reference"
    # Loose check vs full-f32 reference (bounds the bf16 MXU quantization error).
    ref = ref_forward(x, w, gamma, beta, mean, var)
    assert jnp.max(jnp.abs(out - ref)) < 2e-2, "mismatch vs f32 reference"

    print("KERNEL_OK")
</pallas_src>

<mosaic_0001>
module attributes {stable_mosaic.version = 11 : i64} {
  func.func @_down_sampling_kernel(%arg0: i32, %arg1: memref<2x8x8x16xf32, #tpu.memory_space<vmem>>, %arg2: memref<2x8x8x16xf32, #tpu.memory_space<vmem>>, %arg3: memref<2x8x8x16xf32, #tpu.memory_space<vmem>>, %arg4: memref<2x8x8x16xf32, #tpu.memory_space<vmem>>, %arg5: memref<144x16xbf16, #tpu.memory_space<vmem>>, %arg6: memref<1x16xf32, #tpu.memory_space<vmem>>, %arg7: memref<1x16xf32, #tpu.memory_space<vmem>>, %arg8: memref<1x16xf32, #tpu.memory_space<vmem>>, %arg9: memref<2x8x8x32xf32, #tpu.memory_space<vmem>>) attributes {dimension_semantics = [#tpu.dimension_semantics<parallel>], iteration_bounds = array<i64: 1>, scalar_prefetch = 0 : i64, scratch_operands = 0 : i64, tpu.core_type = #tpu.core_type<tc>, window_params = [{transform_indices = @transform_0, window_bounds = array<i64: 2, 8, 8, 16>}, {transform_indices = @transform_1, window_bounds = array<i64: 2, 8, 8, 16>}, {transform_indices = @transform_2, window_bounds = array<i64: 2, 8, 8, 16>}, {transform_indices = @transform_3, window_bounds = array<i64: 2, 8, 8, 16>}, {pipeline_mode = #tpu.pipeline_mode<synchronous>, transform_indices = @transform_4, window_bounds = array<i64: 144, 16>}, {pipeline_mode = #tpu.pipeline_mode<synchronous>, transform_indices = @transform_5, window_bounds = array<i64: 1, 16>}, {pipeline_mode = #tpu.pipeline_mode<synchronous>, transform_indices = @transform_6, window_bounds = array<i64: 1, 16>}, {pipeline_mode = #tpu.pipeline_mode<synchronous>, transform_indices = @transform_7, window_bounds = array<i64: 1, 16>}, {transform_indices = @transform_8, window_bounds = array<i64: 2, 8, 8, 32>}]} {
    %c0 = arith.constant 0 : index
    %c0_0 = arith.constant 0 : index
    %c0_1 = arith.constant 0 : index
    %c0_2 = arith.constant 0 : index
    %0 = vector.load %arg1[%c0, %c0_0, %c0_1, %c0_2] : memref<2x8x8x16xf32, #tpu.memory_space<vmem>>, vector<2x8x8x16xf32>
    %c0_3 = arith.constant 0 : index
    %c0_4 = arith.constant 0 : index
    %c0_5 = arith.constant 0 : index
    %c0_6 = arith.constant 0 : index
    %1 = vector.load %arg2[%c0_3, %c0_4, %c0_5, %c0_6] : memref<2x8x8x16xf32, #tpu.memory_space<vmem>>, vector<2x8x8x16xf32>
    %c0_7 = arith.constant 0 : index
    %c0_8 = arith.constant 0 : index
    %c0_9 = arith.constant 0 : index
    %c0_10 = arith.constant 0 : index
    %2 = vector.load %arg3[%c0_7, %c0_8, %c0_9, %c0_10] : memref<2x8x8x16xf32, #tpu.memory_space<vmem>>, vector<2x8x8x16xf32>
    %c0_11 = arith.constant 0 : index
    %c0_12 = arith.constant 0 : index
    %c0_13 = arith.constant 0 : index
    %c0_14 = arith.constant 0 : index
    %3 = vector.load %arg4[%c0_11, %c0_12, %c0_13, %c0_14] : memref<2x8x8x16xf32, #tpu.memory_space<vmem>>, vector<2x8x8x16xf32>
    %cst = arith.constant 0.000000e+00 : f32
    %4 = vector.broadcast %cst : f32 to vector<2x8x1x16xf32>
    %5 = vector.extract_strided_slice %1 {offsets = [0, 0, 0, 0], sizes = [2, 8, 7, 16], strides = [1, 1, 1, 1]} : vector<2x8x8x16xf32> to vector<2x8x7x16xf32>
    %6 = tpu.concatenate %4, %5 in 2 : vector<2x8x1x16xf32>, vector<2x8x7x16xf32> -> vector<2x8x8x16xf32>
    %cst_15 = arith.constant 0.000000e+00 : f32
    %7 = vector.broadcast %cst_15 : f32 to vector<2x8x1x16xf32>
    %8 = vector.extract_strided_slice %3 {offsets = [0, 0, 0, 0], sizes = [2, 8, 7, 16], strides = [1, 1, 1, 1]} : vector<2x8x8x16xf32> to vector<2x8x7x16xf32>
    %9 = tpu.concatenate %7, %8 in 2 : vector<2x8x1x16xf32>, vector<2x8x7x16xf32> -> vector<2x8x8x16xf32>
    %cst_16 = arith.constant 0.000000e+00 : f32
    %10 = vector.broadcast %cst_16 : f32 to vector<2x1x8x16xf32>
    %11 = vector.extract_strided_slice %2 {offsets = [0, 0, 0, 0], sizes = [2, 7, 8, 16], strides = [1, 1, 1, 1]} : vector<2x8x8x16xf32> to vector<2x7x8x16xf32>
    %12 = tpu.concatenate %10, %11 in 1 : vector<2x1x8x16xf32>, vector<2x7x8x16xf32> -> vector<2x8x8x16xf32>
    %cst_17 = arith.constant 0.000000e+00 : f32
    %13 = vector.broadcast %cst_17 : f32 to vector<2x1x8x16xf32>
    %14 = vector.extract_strided_slice %3 {offsets = [0, 0, 0, 0], sizes = [2, 7, 8, 16], strides = [1, 1, 1, 1]} : vector<2x8x8x16xf32> to vector<2x7x8x16xf32>
    %15 = tpu.concatenate %13, %14 in 1 : vector<2x1x8x16xf32>, vector<2x7x8x16xf32> -> vector<2x8x8x16xf32>
    %cst_18 = arith.constant 0.000000e+00 : f32
    %16 = vector.broadcast %cst_18 : f32 to vector<2x1x8x16xf32>
    %17 = vector.extract_strided_slice %9 {offsets = [0, 0, 0, 0], sizes = [2, 7, 8, 16], strides = [1, 1, 1, 1]} : vector<2x8x8x16xf32> to vector<2x7x8x16xf32>
    %18 = tpu.concatenate %16, %17 in 1 : vector<2x1x8x16xf32>, vector<2x7x8x16xf32> -> vector<2x8x8x16xf32>
    %19 = tpu.concatenate %0, %1, %6, %2, %3, %9, %12, %15, %18 in 3 : vector<2x8x8x16xf32>, vector<2x8x8x16xf32>, vector<2x8x8x16xf32>, vector<2x8x8x16xf32>, vector<2x8x8x16xf32>, vector<2x8x8x16xf32>, vector<2x8x8x16xf32>, vector<2x8x8x16xf32>, vector<2x8x8x16xf32> -> vector<2x8x8x144xf32>
    %20 = vector.shape_cast %19 : vector<2x8x8x144xf32> to vector<128x144xf32>
    %21 = arith.truncf %20 : vector<128x144xf32> to vector<128x144xbf16>
    %c0_19 = arith.constant 0 : index
    %c0_20 = arith.constant 0 : index
    %22 = vector.load %arg5[%c0_19, %c0_20] : memref<144x16xbf16, #tpu.memory_space<vmem>>, vector<144x16xbf16>
    %cst_21 = arith.constant dense<0.000000e+00> : vector<128x16xf32>
    %23 = tpu.matmul %21, %22, %cst_21 {dimension_numbers = #tpu.dot_dimension_numbers<[1], [0], [0], [1], [0, 0, 1, 1], [], []>} : vector<128x144xbf16>, vector<144x16xbf16>, vector<128x16xf32> -> vector<128x16xf32>
    %c0_22 = arith.constant 0 : index
    %c0_23 = arith.constant 0 : index
    %24 = vector.load %arg6[%c0_22, %c0_23] : memref<1x16xf32, #tpu.memory_space<vmem>>, vector<1x16xf32>
    %25 = vector.broadcast %24 : vector<1x16xf32> to vector<128x16xf32>
    %26 = arith.addf %23, %25 : vector<128x16xf32>
    %27 = arith.maximumf %0, %1 : vector<2x8x8x16xf32>
    %28 = arith.maximumf %2, %3 : vector<2x8x8x16xf32>
    %29 = arith.maximumf %27, %28 : vector<2x8x8x16xf32>
    %30 = vector.shape_cast %29 : vector<2x8x8x16xf32> to vector<128x16xf32>
    %c0_24 = arith.constant 0 : index
    %c0_25 = arith.constant 0 : index
    %31 = vector.load %arg7[%c0_24, %c0_25] : memref<1x16xf32, #tpu.memory_space<vmem>>, vector<1x16xf32>
    %32 = vector.broadcast %31 : vector<1x16xf32> to vector<128x16xf32>
    %33 = arith.mulf %30, %32 : vector<128x16xf32>
    %c0_26 = arith.constant 0 : index
    %c0_27 = arith.constant 0 : index
    %34 = vector.load %arg8[%c0_26, %c0_27] : memref<1x16xf32, #tpu.memory_space<vmem>>, vector<1x16xf32>
    %35 = vector.broadcast %34 : vector<1x16xf32> to vector<128x16xf32>
    %36 = arith.addf %33, %35 : vector<128x16xf32>
    %37 = tpu.concatenate %26, %36 in 1 : vector<128x16xf32>, vector<128x16xf32> -> vector<128x32xf32>
    %cst_28 = arith.constant 0.000000e+00 : f32
    %38 = vector.broadcast %cst_28 : f32 to vector<128x32xf32>
    %39 = arith.maximumf %37, %38 : vector<128x32xf32>
    %40 = vector.shape_cast %39 : vector<128x32xf32> to vector<2x8x8x32xf32>
    %c0_29 = arith.constant 0 : index
    %c0_30 = arith.constant 0 : index
    %c0_31 = arith.constant 0 : index
    %c0_32 = arith.constant 0 : index
    %41 = vector.load %arg9[%c0_29, %c0_30, %c0_31, %c0_32] : memref<2x8x8x32xf32, #tpu.memory_space<vmem>>, vector<2x8x8x32xf32>
    tpu.vector_store %arg9[%c0_29, %c0_30, %c0_31, %c0_32], %40 {strides = array<i32>} : memref<2x8x8x32xf32, #tpu.memory_space<vmem>>, vector<2x8x8x32xf32>,
    return
  }
  func.func @transform_0(%arg0: i32) -> (i32, i32, i32, i32) {
    %c0_i32 = arith.constant 0 : i32
    %c0_i32_0 = arith.constant 0 : i32
    %c0_i32_1 = arith.constant 0 : i32
    %c0_i32_2 = arith.constant 0 : i32
    return %arg0, %c0_i32, %c0_i32_0, %c0_i32_1 : i32, i32, i32, i32
  }
  func.func @transform_1(%arg0: i32) -> (i32, i32, i32, i32) {
    %c0_i32 = arith.constant 0 : i32
    %c0_i32_0 = arith.constant 0 : i32
    %c0_i32_1 = arith.constant 0 : i32
    %c0_i32_2 = arith.constant 0 : i32
    return %arg0, %c0_i32, %c0_i32_0, %c0_i32_1 : i32, i32, i32, i32
  }
  func.func @transform_2(%arg0: i32) -> (i32, i32, i32, i32) {
    %c0_i32 = arith.constant 0 : i32
    %c0_i32_0 = arith.constant 0 : i32
    %c0_i32_1 = arith.constant 0 : i32
    %c0_i32_2 = arith.constant 0 : i32
    return %arg0, %c0_i32, %c0_i32_0, %c0_i32_1 : i32, i32, i32, i32
  }
  func.func @transform_3(%arg0: i32) -> (i32, i32, i32, i32) {
    %c0_i32 = arith.constant 0 : i32
    %c0_i32_0 = arith.constant 0 : i32
    %c0_i32_1 = arith.constant 0 : i32
    %c0_i32_2 = arith.constant 0 : i32
    return %arg0, %c0_i32, %c0_i32_0, %c0_i32_1 : i32, i32, i32, i32
  }
  func.func @transform_4(%arg0: i32) -> (i32, i32) {
    %c0_i32 = arith.constant 0 : i32
    %c0_i32_0 = arith.constant 0 : i32
    %c0_i32_1 = arith.constant 0 : i32
    return %c0_i32, %c0_i32_0 : i32, i32
  }
  func.func @transform_5(%arg0: i32) -> (i32, i32) {
    %c0_i32 = arith.constant 0 : i32
    %c0_i32_0 = arith.constant 0 : i32
    %c0_i32_1 = arith.constant 0 : i32
    return %c0_i32, %c0_i32_0 : i32, i32
  }
  func.func @transform_6(%arg0: i32) -> (i32, i32) {
    %c0_i32 = arith.constant 0 : i32
    %c0_i32_0 = arith.constant 0 : i32
    %c0_i32_1 = arith.constant 0 : i32
    return %c0_i32, %c0_i32_0 : i32, i32
  }
  func.func @transform_7(%arg0: i32) -> (i32, i32) {
    %c0_i32 = arith.constant 0 : i32
    %c0_i32_0 = arith.constant 0 : i32
    %c0_i32_1 = arith.constant 0 : i32
    return %c0_i32, %c0_i32_0 : i32, i32
  }
  func.func @transform_8(%arg0: i32) -> (i32, i32, i32, i32) {
    %c0_i32 = arith.constant 0 : i32
    %c0_i32_0 = arith.constant 0 : i32
    %c0_i32_1 = arith.constant 0 : i32
    %c0_i32_2 = arith.constant 0 : i32
    return %arg0, %c0_i32, %c0_i32_0, %c0_i32_1 : i32, i32, i32, i32
  }
}

</mosaic_0001>

<bundles_post_ra>
// kernel: tpu_custom_call.1
= control target key start
LH: loop header
LB: loop body
LE: loop exit
PB: predicated region body
PF: predicated region fallthrough
CT: control target
= control target key end

     0   :  { %13 = vsyncpa [#allocation3], 0  ;;  %s2663_s0 = inlined_call_operand.hbm [shape: f32[2,8,8,16], index: 0, kind: input, shape index: {}]   ;;  %s2664_s1 = inlined_call_operand.hbm [shape: f32[2,8,8,16], index: 1, kind: input, shape index: {}]   ;;  %s2665_s2 = inlined_call_operand.hbm [shape: f32[2,8,8,16], index: 2, kind: input, shape index: {}]   ;;  %s2666_s3 = inlined_call_operand.hbm [shape: f32[2,8,8,16], index: 3, kind: input, shape index: {}]   ;;  %s2667_s4 = inlined_call_operand.vmem [shape: bf16[144,16], index: 4, kind: input, shape index: {}]   ;;  %s2668_s5 = inlined_call_operand.vmem [shape: f32[1,16], index: 5, kind: input, shape index: {}]   ;;  %s2669_s6 = inlined_call_operand.vmem [shape: f32[1,16], index: 6, kind: input, shape index: {}]   ;;  %s2670_s7 = inlined_call_operand.vmem [shape: f32[1,16], index: 7, kind: input, shape index: {}]   ;;  %s2671_s8 = inlined_call_operand.hbm [shape: f32[2,8,8,32], index: 8, kind: output, shape index: {}]  }
   0x1   :  { %14 = vsyncpa [#allocation6], 0 }
   0x2   :  { %15 = vsyncpa [#allocation9], 0 }
   0x3   :  { %16 = vsyncpa [#allocation4], 0  ;;  %s34_s29 = sshll.u32 %s2664_s1, 4  ;;  %s1702_s30 = smov [#allocation5]   ;;  %s35_s29 = int_to_ptr.hbm [resolvable:$true] %s34_s29 }
   0x4   :  { %s36_s9 = sshll.u32 %s1702_s30, 4  ;;  %s21_s12 = sshll.u32 %s2663_s0, 4  ;;  %s37_s9 = int_to_ptr.vmem [resolvable:$true] %s36_s9  ;;  %s22_s12 = int_to_ptr.hbm [resolvable:$true] %s21_s12 }
   0x5   :  { %s1703_s13 = smov 128   ;;  %s1704_s14 = smov 8  }
   0x6   :  { %42 = dma.hbm_to_vmem [thread:$0]  %s35_s29, 2048, %s37_s9, [#allocation6], %s1703_s13, %s1703_s13, %s1704_s14  }
   0x7   :  { %s1705_s15 = smov [#allocation2]   ;;  %s47_s1 = sshll.u32 %s2665_s2, 4  ;;  %s48_s1 = int_to_ptr.hbm [resolvable:$true] %s47_s1 }
   0x8   :  { %s23_s16 = sshll.u32 %s1705_s15, 4  ;;  %s60_s20 = sshll.u32 %s2666_s3, 4  ;;  %s24_s16 = int_to_ptr.vmem [resolvable:$true] %s23_s16  ;;  %s61_s20 = int_to_ptr.hbm [resolvable:$true] %s60_s20 }
   0x9   :  { %29 = dma.hbm_to_vmem [thread:$0]  %s22_s12, 2048, %s24_s16, [#allocation3], %s1703_s13, %s1703_s13, %s1704_s14  }
   0xa   :  { %s1706_s21 = smov [#allocation7]   ;;  %s1707_s23 = smov [#allocation8]  }
   0xb   :  { %s49_s22 = sshll.u32 %s1706_s21, 4  ;;  %s62_s2 = sshll.u32 %s1707_s23, 4  ;;  %s50_s22 = int_to_ptr.vmem [resolvable:$true] %s49_s22  ;;  %s63_s2 = int_to_ptr.vmem [resolvable:$true] %s62_s2 }
   0xc   :  { %55 = dma.hbm_to_vmem [thread:$0]  %s48_s1, 2048, %s50_s22, [#allocation6], %s1703_s13, %s1703_s13, %s1704_s14  }
   0xd   :  { %68 = dma.hbm_to_vmem [thread:$0]  %s61_s20, 2048, %s63_s2, [#allocation9], %s1703_s13, %s1703_s13, %s1704_s14  }
   0xe   :  { %1694 = dma.done.wait [#allocation3], 2048  }
   0xf   :  { %1695 = vsyncadd [#allocation3], 4294965248 }
  0x10   :  { %1696 = dma.done.wait [#allocation6], 4096  }
  0x11   :  { %1697 = vsyncadd [#allocation6], 4294963200 }
  0x12   :  { %1698 = dma.done.wait [#allocation9], 2048  }
  0x13   :  { %1699 = vsyncadd [#allocation9], 4294965248  ;;  %v1786_v0 = vld [vmem:[#allocation5 + $0x40] sm:$0xff]  ;;  %v1788_v1 = vld [vmem:[#allocation5 + $0x48] sm:$0xff]  ;;  %s1708_s3 = smov 16   ;;  %vm206_vm0 = vcmask 1040384  }
  0x14   :  { %2696 = vst [vmem:[#allocation15_spill] sm:$0xff] %v1788_v1  ;;  %v1317_v2 = vpack.i.bf16 %v1788_v1, %v1786_v0  ;;  %v1792_v3 = vld [vmem:[#allocation5 + $0x20] sm:$0xff]  ;;  %v1794_v4 = vld [vmem:[#allocation5 + $0x28] sm:$0xff]  ;;  %v1806_v9 = vld [vmem:[#allocation5 + $0x50] sm:$0xff]  ;;  %s1709_s24 = smov 32   ;;  %v183_v57 = vrot.slane %v1788_v1, 7 }
  0x15   :  { %v1307_v5 = vpack.i.bf16 %v1794_v4, %v1792_v3  ;;  %v1798_v6 = vld [vmem:[#allocation5] sm:$0xff]  ;;  %v1801_v7 = vld [vmem:[#allocation5 + $0x8] sm:$0xff]  ;;  %v1808_v10 = vld [vmem:[#allocation5 + $0x58] sm:$0xff]  ;;  %v179_v36 = vrot.slane %v1794_v4, 7  ;;  %v178_v37 = vrot.slane %v1792_v3, 7  ;;  %v184_v54 = vrot.slane %v1806_v9, 7 }
  0x16   :  { %1318 = vrot.lane.b32.xlu2 %v1317_v2, %s1708_s3  ;;  %v1297_v8 = vpack.i.bf16 %v1801_v7, %v1798_v6  ;;  %2697 = vst [vmem:[#allocation16_spill] sm:$0xff] %v1808_v10  ;;  %v1810_v11 = vld [vmem:[#allocation5 + $0x30] sm:$0xff]  ;;  %v1812_v12 = vld [vmem:[#allocation5 + $0x38] sm:$0xff]  ;;  %v1322_v13 = vpack.i.bf16 %v1808_v10, %v1806_v9  ;;  %v175_v16 = vrot.slane %v1801_v7, 7  ;;  %v174_v17 = vrot.slane %v1798_v6, 7  ;;  %v1835_v24 = vld [vmem:[#allocation7 + $0x8] sm:$0xff] }
  0x17   :  { %1308 = vrot.lane.b32.xlu1 %v1307_v5, %s1708_s3  ;;  %v1817_v14 = vld [vmem:[#allocation5 + $0x10] sm:$0xff]  ;;  %v1819_v15 = vld [vmem:[#allocation5 + $0x18] sm:$0xff]  ;;  %v1312_v18 = vpack.i.bf16 %v1812_v12, %v1810_v11  ;;  %v1837_v25 = vld [vmem:[#allocation8 + $0x8] sm:$0xff]  ;;  %v180_v33 = vrot.slane %v1810_v11, 7  ;;  %v181_v34 = vrot.slane %v1812_v12, 7  ;;  %v211_v43 = vsel %vm206_vm0, 0.0, %v178_v37 }
  0x18   :  { %1298 = vrot.lane.b32.xlu0 %v1297_v8, %s1708_s3  ;;  %v1302_v19 = vpack.i.bf16 %v1819_v15, %v1817_v14  ;;  %v1829_v20 = vld [vmem:[#allocation5 + $0x70] sm:$0xff]  ;;  %v1831_v21 = vld [vmem:[#allocation5 + $0x78] sm:$0xff]  ;;  %v207_v22 = vsel %vm206_vm0, 0.0, %v174_v17  ;;  %v208_v23 = vsel %vm206_vm0, 0.0, %v175_v16  ;;  %v122_v26 = vld [vmem:[#allocation5 + $0x60] sm:$0xff]  ;;  %v176_v39 = vrot.slane %v1817_v14, 7 }
  0x19   :  { %v123_v27 = vld [vmem:[#allocation5 + $0x68] sm:$0xff]  ;;  %v1840_v28 = vld [vmem:[#allocation7] sm:$0xff]  ;;  %v1337_v30 = vpack.i.bf16 %v208_v23, %v207_v22  ;;  %v1332_v32 = vpack.i.bf16 %v1831_v21, %v1829_v20  ;;  %v177_v40 = vrot.slane %v1819_v15, 7  ;;  %v213_v41 = vsel %vm206_vm0, 0.0, %v180_v33  ;;  %s1710_s25 = smov 48   ;;  %v1907_v33 = vld [vmem:[#allocation7 + $0x38] sm:$0xff] }
  0x1a   :  { %v1844_v31 = vld [vmem:[#allocation8] sm:$0xff]  ;;  %v1327_v38 = vpack.i.bf16 %v123_v27, %v122_v26  ;;  %v214_v42 = vsel %vm206_vm0, 0.0, %v181_v34  ;;  %v212_v44 = vsel %vm206_vm0, 0.0, %v179_v36  ;;  %v209_v47 = vsel %vm206_vm0, 0.0, %v176_v39  ;;  %v1912_v36 = vld [vmem:[#allocation7 + $0x28] sm:$0xff]  ;;  %s1711_s26 = smov 64  }
  0x1b   :  { %v1863_v45 = vld [vmem:[#allocation7 + $0x60] sm:$0xff]  ;;  %v210_v48 = vsel %vm206_vm0, 0.0, %v177_v40  ;;  %v1352_v49 = vpack.i.bf16 %v214_v42, %v213_v41  ;;  %v1347_v51 = vpack.i.bf16 %v212_v44, %v211_v43  ;;  %v186_v52 = vrot.slane %v122_v26, 7  ;;  %v1924_v41 = vld [vmem:[#allocation8 + $0x48] sm:$0xff]  ;;  %v1929_v43 = vld [vmem:[#allocation7 + $0x50] sm:$0xff]  ;;  %s1713_s27 = smov 112  }
  0x1c   :  { %2698 = vst [vmem:[#allocation17_spill] sm:$0xff] %v1863_v45  ;;  %v1865_v46 = vld [vmem:[#allocation8 + $0x60] sm:$0xff]  ;;  %v187_v53 = vrot.slane %v123_v27, 7  ;;  %v185_v55 = vrot.slane %v1808_v10, 7  ;;  %v1342_v56 = vpack.i.bf16 %v210_v48, %v209_v47  ;;  %v182_v58 = vrot.slane %v1786_v0, 7  ;;  %v1926_v42 = vld [vmem:[#allocation7 + $0x68] sm:$0xff] }
  0x1d   :  { %2699 = vst [vmem:[#allocation18_spill] sm:$0xff] %v1865_v46  ;;  %v219_v59 = vsel %vm206_vm0, 0.0, %v186_v52  ;;  %v217_v61 = vsel %vm206_vm0, 0.0, %v184_v54  ;;  %v216_v2 = vsel %vm206_vm0, 0.0, %v183_v57  ;;  %v188_v16 = vrot.slane %v1829_v20, 7  ;;  %v1910_v34 = vld [vmem:[#allocation7 + $0x20] sm:$0xff] }
  0x1e   :  { %1323 = vrot.lane.b32.xlu2 %v1322_v13, %s1708_s3  ;;  %v220_v60 = vsel %vm206_vm0, 0.0, %v187_v53  ;;  %v218_v62 = vsel %vm206_vm0, 0.0, %v185_v55  ;;  %v215_v63 = vsel %vm206_vm0, 0.0, %v182_v58  ;;  %v189_v17 = vrot.slane %v1831_v21, 7  ;;  %v1901_v21 = vld [vmem:[#allocation7 + $0x40] sm:$0xff]  ;;  %2702 = vst [vmem:[#allocation21_spill] sm:$0xff] %v1924_v41 }
  0x1f   :  { %1313 = vrot.lane.b32.xlu1 %v1312_v18, %s1708_s3  ;;  %v1367_v5 = vpack.i.bf16 %v220_v60, %v219_v59  ;;  %v1362_v8 = vpack.i.bf16 %v218_v62, %v217_v61  ;;  %v1357_v13 = vpack.i.bf16 %v216_v2, %v215_v63  ;;  %v1888_v18 = vld [vmem:[#allocation7 + $0x10] sm:$0xff]  ;;  %v221_v22 = vsel %vm206_vm0, 0.0, %v188_v16  ;;  %v1922_v40 = vld [vmem:[#allocation8 + $0x40] sm:$0xff]  ;;  %2703 = vst [vmem:[#allocation22_spill] sm:$0xff] %v1926_v42  ;;  %v1931_v44 = vld [vmem:[#allocation7 + $0x58] sm:$0xff]  ;;  %s1714_s28 = smov 96  }
  0x20   :  { %1303 = vrot.lane.b32.xlu0 %v1302_v19, %s1708_s3  ;;  %v1890_v19 = vld [vmem:[#allocation7 + $0x18] sm:$0xff]  ;;  %v222_v23 = vsel %vm206_vm0, 0.0, %v189_v17  ;;  %v1377_v20 = vpack.i.bf16 %v1835_v24, %v1840_v28  ;;  %v1387_v39 = vpack.i.bf16 %v1912_v36, %v1910_v34  ;;  %2704 = vst [vmem:[#allocation23_spill] sm:$0xff] %v1929_v43  ;;  %v1412_v47 = vpack.i.bf16 %v1924_v41, %v1922_v40  ;;  %v1964_v63 = vld [vmem:[#allocation8 + $0x50] sm:$0xff]  ;;  %s1715_s29 = smov 80   ;;  %v2051_v50 = vld [vmem:[#allocation8 + $0x28] sm:$0xff] }
  0x21   :  { %v1382_v26 = vpack.i.bf16 %v1890_v19, %v1888_v18  ;;  %v1372_v27 = vpack.i.bf16 %v222_v23, %v221_v22  ;;  %2705 = vst [vmem:[#allocation24_spill] sm:$0xff] %v1931_v44  ;;  %v1407_v48 = vpack.i.bf16 %v1926_v42, %v1863_v45  ;;  %v248_v52 = vrot.slane %v1924_v41, 7  ;;  %v1966_v2 = vld [vmem:[#allocation8 + $0x58] sm:$0xff]  ;;  %s1205_s30 = sshll.u32 %s2671_s8, 4  ;;  %s1206_s30 = int_to_ptr.hbm [resolvable:$true] %s1205_s30 }
  0x22   :  { %v2672_v55 = vmov 0.0   ;;  %v239_v58 = vrot.slane %v1844_v31, 7  ;;  %v240_v59 = vrot.slane %v1837_v25, 7  ;;  %2706 = vst [vmem:[#allocation25_spill] sm:$0xff] %v1966_v2  ;;  %v250_v16 = vrot.slane %v1966_v2, 7 }
  0x23   :  { %v1948_v54 = vsel %vm206_vm0, 0.0, %v248_v52  ;;  %v1422_v57 = vpack.i.bf16 %v1901_v21, %v2672_v55  ;;  %v1432_v17 = vpack.i.bf16 %v1837_v25, %v1844_v31  ;;  %v2008_v52 = vld [vmem:[#allocation8 + $0x68] sm:$0xff]  ;;  %vm666_vm1 = vcmask 130048  }
  0x24   :  { %v271_v61 = vsel %vm206_vm0, 0.0, %v239_v58  ;;  %v1962_v62 = vsel %vm206_vm0, 0.0, %v240_v59  ;;  %v1982_v23 = vsel %vm206_vm0, 0.0, %v250_v16  ;;  %2708 = vst [vmem:[#allocation27_spill] sm:$0xff] %v2008_v52  ;;  %v2016_v59 = vld [vmem:[#allocation7 + $0x78] sm:$0xff]  ;;  %v2049_v16 = vld [vmem:[#allocation8 + $0x20] sm:$0xff] }
  0x25   :  { %2707 = vst [vmem:[#allocation26_spill] sm:$0xff] %v1982_v23  ;;  %v1512_v29 = vpack.i.bf16 %v2051_v50, %v2049_v16  ;;  %vm683_vm2 = vcmask 261120   ;;  %vm700_vm3 = vcmask 392192   ;;  %vm717_vm4 = vcmask 523264  }
  0x26   :  { %1338 = vrot.lane.b32.xlu2 %v1337_v30, %s1709_s24  ;;  %v1903_v30 = vld [vmem:[#allocation7 + $0x48] sm:$0xff]  ;;  %2710 = vst [vmem:[#allocation29_spill] sm:$0xff] %v2016_v59  ;;  %vm734_vm5 = vcmask 654336   ;;  %vm751_vm6 = vcmask 785408   ;;  %vm768_vm7 = vcmask 916480  }
  0x27   :  { %1333 = vrot.lane.b32.xlu1 %v1332_v32, %s1708_s3  ;;  %2700 = vst [vmem:[#allocation19_spill] sm:$0xff] %v1903_v30  ;;  %v1905_v32 = vld [vmem:[#allocation7 + $0x30] sm:$0xff]  ;;  %v1397_v37 = vpack.i.bf16 %v1903_v30, %v1901_v21 }
  0x28   :  { %1328 = vrot.lane.b32.xlu0 %v1327_v38, %s1708_s3  ;;  %2701 = vst [vmem:[#allocation20_spill] sm:$0xff] %v1905_v32  ;;  %v1392_v38 = vpack.i.bf16 %v1907_v33, %v1905_v32 }
  0x2e   :  { %1353 = vrot.lane.b32.xlu2 %v1352_v49, %s1709_s24  ;;  %v1402_v49 = vpack.i.bf16 %v1931_v44, %v1929_v43 }
  0x2f   :  { %1348 = vrot.lane.b32.xlu1 %v1347_v51, %s1709_s24  ;;  %v247_v51 = vrot.slane %v1922_v40, 7 }
  0x30   :  { %1343 = vrot.lane.b32.xlu0 %v1342_v56, %s1709_s24  ;;  %v1427_v56 = vpack.i.bf16 %v1922_v40, %v2672_v55 }
  0x31   :  { %v1945_v53 = vsel %vm206_vm0, 0.0, %v247_v51 }
  0x32   :  { %v1417_v60 = vpack.i.bf16 %v1948_v54, %v1945_v53 }
  0x36   :  { %1368 = vrot.lane.b32.xlu2 %v1367_v5, %s1709_s24  ;;  %v1442_v5 = vpack.i.bf16 %v1903_v30, %v1840_v28  ;;  %v2117_v30 = vld [vmem:[#allocation8 + $0x38] sm:$0xff] }
  0x37   :  { %1363 = vrot.lane.b32.xlu1 %v1362_v8, %s1709_s24  ;;  %v1437_v8 = vpack.i.bf16 %v1962_v62, %v271_v61 }
  0x38   :  { %1358 = vrot.lane.b32.xlu0 %v1357_v13, %s1709_s24  ;;  %v249_v13 = vrot.slane %v1964_v63, 7 }
  0x3a   :  { %v1979_v22 = vsel %vm206_vm0, 0.0, %v249_v13 }
  0x3e   :  { %1383 = vrot.lane.b32.xlu2 %v1382_v26, %s1710_s25  ;;  %v1457_v26 = vpack.i.bf16 %v1982_v23, %v1979_v22 }
  0x3f   :  { %1378 = vrot.lane.b32.xlu1 %v1377_v20, %s1710_s25  ;;  %v1452_v20 = vpack.i.bf16 %v1966_v2, %v1964_v63 }
  0x40   :  { %1373 = vrot.lane.b32.xlu0 %v1372_v27, %s1709_s24  ;;  %v1447_v27 = vpack.i.bf16 %v1924_v41, %v1844_v31 }
  0x46   :  { %1398 = vrot.lane.b32.xlu2 %v1397_v37, %s1710_s25  ;;  %v1993_v37 = vld [vmem:[#allocation8 + $0x10] sm:$0xff] }
  0x47   :  { %1393 = vrot.lane.b32.xlu1 %v1392_v38, %s1710_s25  ;;  %v1995_v38 = vld [vmem:[#allocation8 + $0x18] sm:$0xff]  ;;  %v1487_v13 = vpack.i.bf16 %v1966_v2, %v1993_v37 }
  0x48   :  { %1388 = vrot.lane.b32.xlu0 %v1387_v39, %s1710_s25  ;;  %v1472_v39 = vpack.i.bf16 %v1995_v38, %v1993_v37  ;;  %v242_v51 = vrot.slane %v1995_v38, 7 }
  0x4e   :  { %1413 = vrot.lane.b32.xlu2 %v1412_v47, %s1711_s26  ;;  %v1467_v47 = vpack.i.bf16 %v1837_v25, %v1964_v63 }
  0x4f   :  { %1408 = vrot.lane.b32.xlu1 %v1407_v48, %s1710_s25  ;;  %v1462_v48 = vpack.i.bf16 %v1835_v24, %v1929_v43 }
  0x50   :  { %1403 = vrot.lane.b32.xlu0 %v1402_v49, %s1710_s25  ;;  %v241_v49 = vrot.slane %v1993_v37, 7 }
  0x52   :  { %v273_v58 = vsel %vm206_vm0, 0.0, %v241_v49 }
  0x56   :  { %1428 = vrot.lane.b32.xlu2 %v1427_v56, %s1713_s27 }
  0x57   :  { %1423 = vrot.lane.b32.xlu1 %v1422_v57, %s1714_s28  ;;  %v2012_v57 = vld [vmem:[#allocation7 + $0x70] sm:$0xff] }
  0x58   :  { %1418 = vrot.lane.b32.xlu0 %v1417_v60, %s1715_s29  ;;  %2709 = vst [vmem:[#allocation28_spill] sm:$0xff] %v2012_v57  ;;  %v2018_v60 = vld [vmem:[#allocation8 + $0x70] sm:$0xff] }
  0x59   :  { %2711 = vst [vmem:[#allocation30_spill] sm:$0xff] %v2018_v60 }
  0x5e   :  { %1443 = vrot.lane.b32.xlu2 %v1442_v5, %s1714_s28  ;;  %v2020_v5 = vld [vmem:[#allocation8 + $0x78] sm:$0xff] }
  0x5f   :  { %1438 = vrot.lane.b32.xlu1 %v1437_v8, %s1715_s29  ;;  %2712 = vst [vmem:[#allocation31_spill] sm:$0xff] %v2020_v5  ;;  %v2023_v8 = vsel %vm206_vm0, 0.0, %v242_v51 }
  0x60   :  { %1433 = vrot.lane.b32.xlu0 %v1432_v17, %s1711_s26  ;;  %v244_v17 = vrot.slane %v2051_v50, 7 }
  0x66   :  { %1458 = vrot.lane.b32.xlu2 %v1457_v26, %s1715_s29  ;;  %v1482_v26 = vpack.i.bf16 %v1931_v44, %v1888_v18 }
  0x67   :  { %1453 = vrot.lane.b32.xlu1 %v1452_v20, %s1711_s26  ;;  %v251_v20 = vrot.slane %v1865_v46, 7 }
  0x68   :  { %1448 = vrot.lane.b32.xlu0 %v1447_v27, %s1713_s27  ;;  %v252_v27 = vrot.slane %v2008_v52, 7 }
  0x69   :  { %v2044_v49 = vsel %vm206_vm0, 0.0, %v251_v20 }
  0x6a   :  { %2713 = vst [vmem:[#allocation32_spill] sm:$0xff] %v2044_v49  ;;  %v2047_v51 = vsel %vm206_vm0, 0.0, %v252_v27  ;;  %v243_v27 = vrot.slane %v2049_v16, 7 }
  0x6b   :  { %2714 = vst [vmem:[#allocation33_spill] sm:$0xff] %v2047_v51  ;;  %v1497_v20 = vpack.i.bf16 %v2047_v51, %v2044_v49 }
  0x6e   :  { %1473 = vrot.lane.b32.xlu2 %v1472_v39, %s1711_s26  ;;  %v1477_v39 = vpack.i.bf16 %v2023_v8, %v273_v58 }
  0x6f   :  { %1468 = vrot.lane.b32.xlu1 %v1467_v47, %s1713_s27  ;;  %v1272_v47 = vld [vmem:[%s2667_s4 + $0x40] sm:$0xff] }
  0x70   :  { %v2010_v56 = vpop.permute.xlu2 %1318  ;;  %1463 = vrot.lane.b32.xlu0 %v1462_v48, %s1714_s28  ;;  %957 = vmatpush.bf16.msra.mxu1 %v1272_v47 }
  0x71   :  { %1281 = vmatpush.bf16.msra.mxu3 %v1272_v47  ;;  %v1492_v47 = vpack.i.bf16 %v2008_v52, %v1865_v46 }
  0x76   :  { %1488 = vrot.lane.b32.xlu2 %v1487_v13, %s1713_s27  ;;  %v786_v13 = vpack.c.bf16 %v271_v61, %v2672_v55  ;;  %v2067_v61 = vsel %vm206_vm0, 0.0, %v243_v27  ;;  %v788_v27 = vpack.c.bf16 %v273_v58, %v1962_v62 }
  0x77   :  { %1483 = vrot.lane.b32.xlu1 %v1482_v26, %s1714_s28  ;;  %v1502_v26 = vpack.i.bf16 %v1890_v19, %v1863_v45  ;;  %v1527_v45 = vpack.i.bf16 %v2008_v52, %v2049_v16 }
  0x78   :  { %v2041_v48 = vpop.permute.xlu2 %1323  ;;  %1478 = vrot.lane.b32.xlu0 %v1477_v39, %s1715_s29  ;;  %1256 = vmatmul.msk.bf16.vlgmr.msra.gmra.mxu1 %vm666_vm1, %v786_v13  ;;  %v2070_v39 = vsel %vm206_vm0, 0.0, %v244_v17 }
  0x79   :  { %v1517_v13 = vpack.i.bf16 %v2070_v39, %v2067_v61 }
  0x7e   :  { %1503 = vrot.lane.b32.xlu2 %v1502_v26, %s1714_s28  ;;  %v1507_v26 = vpack.i.bf16 %v1995_v38, %v1865_v46  ;;  %v2106_v46 = vld [vmem:[#allocation2 + $0x38] sm:$0xff] }
  0x7f   :  { %1498 = vrot.lane.b32.xlu1 %v1497_v20, %s1715_s29 }
  0x80   :  { %v2072_v35 = vpop.permute.xlu2 %1338  ;;  %1493 = vrot.lane.b32.xlu0 %v1492_v47, %s1711_s26  ;;  %v1532_v47 = vpack.i.bf16 %v2016_v59, %v2012_v57  ;;  %v2104_v59 = vld [vmem:[#allocation2 + $0x30] sm:$0xff] }
  0x86   :  { %1518 = vrot.lane.b32.xlu2 %v1517_v13, %s1715_s29  ;;  %v253_v13 = vrot.slane %v2018_v60, 7 }
  0x87   :  { %1513 = vrot.lane.b32.xlu1 %v1512_v29, %s1711_s26  ;;  %v254_v29 = vrot.slane %v2020_v5, 7 }
  0x88   :  { %v1354_v20 = vpop.permute.xlu2 %1353  ;;  %1508 = vrot.lane.b32.xlu0 %v1507_v26, %s1713_s27  ;;  %1257 = vmatmul.msk.bf16.gmra.mxu1 %vm666_vm1, %v788_v27  ;;  %v1522_v26 = vpack.i.bf16 %v1926_v42, %v1910_v34  ;;  %v2101_v62 = vsel %vm206_vm0, 0.0, %v253_v13 }
  0x89   :  { %v2084_v17 = vpop.permute.xlu1 %1308  ;;  %2715 = vst [vmem:[#allocation34_spill] sm:$0xff] %v2101_v62  ;;  %v286_v58 = vsel %vm206_vm0, 0.0, %v254_v29  ;;  %v1356_v27 = vunpack.i.h.bf16 %v1354_v20  ;;  %v1355_v52 = vunpack.i.l.bf16 %v1354_v20 }
  0x8a   :  { %v2089_v55 = vpop.permute.xlu0 %1298  ;;  %v1542_v29 = vpack.i.bf16 %v286_v58, %v2101_v62  ;;  %v246_v58 = vrot.slane %v2117_v30, 7 }
  0x8e   :  { %1533 = vrot.lane.b32.xlu2 %v1532_v47, %s1710_s25  ;;  %v1271_v47 = vld [vmem:[%s2667_s4 + $0x38] sm:$0xff] }
  0x8f   :  { %1528 = vrot.lane.b32.xlu1 %v1527_v45, %s1713_s27  ;;  %v1547_v45 = vpack.i.bf16 %v1912_v36, %v2012_v57  ;;  %v2125_v57 = vld [vmem:[#allocation8 + $0x30] sm:$0xff]  ;;  %1273 = vmatpush.bf16.msra.mxu2 %v1271_v47 }
  0x90   :  { %1523 = vrot.lane.b32.xlu0 %v1522_v26, %s1714_s28  ;;  %v1369_v49 = vpop.permute.xlu2 %1368  ;;  %901 = vmatpush.bf16.msra.mxu0 %v1271_v47  ;;  %v245_v41 = vrot.slane %v2125_v57, 7 }
  0x91   :  { %v1314_v51 = vpop.permute.xlu1 %1313 }
  0x92   :  { %v1316_v42 = vunpack.i.h.bf16 %v1314_v51  ;;  %v1315_v23 = vunpack.i.l.bf16 %v1314_v51  ;;  %v2114_v13 = vpop.permute.xlu0 %1303  ;;  %v1537_v51 = vpack.i.bf16 %v2020_v5, %v2018_v60  ;;  %v2141_v47 = vsel %vm206_vm0, 0.0, %v245_v41  ;;  %v2155_v41 = vld [vmem:[#allocation2 + $0x68] sm:$0xff] }
  0x93   :  { %v278_v5 = vsel %vm206_vm0, 0.0, %v246_v58  ;;  %2717 = vst [vmem:[#allocation36_spill] sm:$0xff] %v2155_v41  ;;  %v1370_v58 = vunpack.i.l.bf16 %v1369_v49 }
  0x94   :  { %v673_v20 = vsel %vm666_vm1, %v2104_v59, %v1315_v23  ;;  %v674_v26 = vsel %vm666_vm1, %v2106_v46, %v1316_v42  ;;  %v1270_v42 = vld [vmem:[%s2667_s4 + $0x30] sm:$0xff] }
  0x95   :  { %v2130_v62 = vsel %vm683_vm2, %v673_v20, %v1355_v52  ;;  %v2133_v23 = vsel %vm683_vm2, %v674_v26, %v1356_v27  ;;  %v790_v52 = vpack.c.bf16 %v2067_v61, %v2023_v8  ;;  %1274 = vmatpush.bf16.msra.mxu2 %v1270_v42  ;;  %902 = vmatpush.bf16.msra.mxu0 %v1270_v42  ;;  %v2153_v20 = vld [vmem:[#allocation2 + $0x60] sm:$0xff]  ;;  %v1371_v26 = vunpack.i.h.bf16 %v1369_v49 }
  0x96   :  { %1548 = vrot.lane.b32.xlu2 %v1547_v45, %s1714_s28  ;;  %v1557_v45 = vpack.i.bf16 %v278_v5, %v2141_v47  ;;  %2716 = vst [vmem:[#allocation35_spill] sm:$0xff] %v2153_v20  ;;  %v1552_v61 = vpack.i.bf16 %v2117_v30, %v2125_v57  ;;  %v1268_v49 = vld [vmem:[%s2667_s4 + $0x20] sm:$0xff] }
  0x97   :  { %1543 = vrot.lane.b32.xlu1 %v1542_v29, %s1715_s29  ;;  %v1269_v29 = vld [vmem:[%s2667_s4 + $0x28] sm:$0xff] }
  0x98   :  { %1538 = vrot.lane.b32.xlu0 %v1537_v51, %s1711_s26  ;;  %v2157_v8 = vpop.permute.xlu2 %1383  ;;  %1258 = vmatmul.msk.bf16.gmra.mxu1 %vm666_vm1, %v790_v52  ;;  %v1310_v52 = vunpack.i.l.bf16 %v2084_v17 }
  0x99   :  { %v2147_v27 = vpop.permute.xlu1 %1333  ;;  %2718 = vst [vmem:[#allocation37_spill] sm:$0xff] %v2157_v8  ;;  %1275 = vmatpush.bf16.msra.mxu2 %v1269_v29  ;;  %903 = vmatpush.bf16.msra.mxu0 %v1269_v29  ;;  %v1311_v8 = vunpack.i.h.bf16 %v2084_v17 }
  0x9a   :  { %v1329_v44 = vpop.permute.xlu0 %1328 }
  0x9b   :  { %v1331_v51 = vunpack.i.h.bf16 %v1329_v44  ;;  %v1330_v5 = vunpack.i.l.bf16 %v1329_v44 }
  0x9d   :  { %v679_v42 = vsel %vm666_vm1, %v2153_v20, %v1330_v5  ;;  %v680_v2 = vsel %vm666_vm1, %v2155_v41, %v1331_v51  ;;  %v2179_v5 = vld [vmem:[#allocation2 + $0x20] sm:$0xff]  ;;  %v2181_v51 = vld [vmem:[#allocation2 + $0x28] sm:$0xff]  ;;  %1276 = vmatpush.bf16.msra.mxu2 %v1268_v49  ;;  %904 = vmatpush.bf16.msra.mxu0 %v1268_v49  ;;  %v1305_v20 = vunpack.i.l.bf16 %v2114_v13 }
  0x9e   :  { %1558 = vrot.lane.b32.xlu2 %v1557_v45, %s1715_s29  ;;  %v2174_v44 = vsel %vm683_vm2, %v679_v42, %v1370_v58  ;;  %v2177_v29 = vsel %vm683_vm2, %v680_v2, %v1371_v26  ;;  %v1306_v45 = vunpack.i.h.bf16 %v2114_v13  ;;  %v2187_v58 = vld [vmem:[#allocation2 + $0x18] sm:$0xff]  ;;  %v671_v49 = vsel %vm666_vm1, %v2179_v5, %v1310_v52 }
  0x9f   :  { %1553 = vrot.lane.b32.xlu1 %v1552_v61, %s1711_s26  ;;  %2719 = vst [vmem:[#allocation38_spill] sm:$0xff] %v2174_v44  ;;  %v96_v61 = vld [vmem:[#allocation2 + $0x10] sm:$0xff]  ;;  %v1267_v26 = vld [vmem:[%s2667_s4 + $0x18] sm:$0xff] }
  0xa0   :  { %2720 = vst [vmem:[#allocation39_spill] sm:$0xff] %v2177_v29  ;;  %649 = vrot.lane.b32.xlu0 %v2018_v60, %s1713_s27  ;;  %v672_v29 = vsel %vm666_vm1, %v2181_v51, %v1311_v8  ;;  %v1562_v60 = vpack.i.bf16 %v2125_v57, %v2051_v50  ;;  %v669_v1 = vsel %vm666_vm1, %v96_v61, %v1305_v20  ;;  %v2207_v8 = vpop.permute.xlu2 %1398 }
  0xa1   :  { %v1349_v17 = vpop.permute.xlu1 %1348  ;;  %1277 = vmatpush.bf16.msra.mxu2 %v1267_v26  ;;  %905 = vmatpush.bf16.msra.mxu0 %v1267_v26  ;;  %v670_v52 = vsel %vm666_vm1, %v2187_v58, %v1306_v45  ;;  %v792_v20 = vpack.c.bf16 %v2141_v47, %v2070_v39  ;;  %v1264_v39 = vld [vmem:[%s2667_s4] sm:$0xff]  ;;  %v1336_v26 = vunpack.i.h.bf16 %v2147_v27 }
  0xa2   :  { %v1351_v42 = vunpack.i.h.bf16 %v1349_v17  ;;  %v1350_v2 = vunpack.i.l.bf16 %v1349_v17  ;;  %v1344_v13 = vpop.permute.xlu0 %1343 }
  0xa3   :  { %v1346_v17 = vunpack.i.h.bf16 %v1344_v13  ;;  %v1345_v10 = vunpack.i.l.bf16 %v1344_v13 }
  0xa4   :  { %v2199_v44 = vsel %vm683_vm2, %v671_v49, %v1350_v2  ;;  %v2202_v41 = vsel %vm683_vm2, %v672_v29, %v1351_v42  ;;  %v1266_v29 = vld [vmem:[%s2667_s4 + $0x10] sm:$0xff]  ;;  %v1017_v42 = vmax.f32 %v1888_v18, %v1993_v37  ;;  %v1335_v49 = vunpack.i.l.bf16 %v2147_v27  ;;  %v2255_v37 = vld [vmem:[%s2670_s7] ss:$0 sm:$0xff] }
  0xa5   :  { %v2210_v43 = vsel %vm683_vm2, %v669_v1, %v1345_v10  ;;  %v2213_v2 = vsel %vm683_vm2, %v670_v52, %v1346_v17  ;;  %1278 = vmatpush.bf16.msra.mxu2 %v1266_v29  ;;  %906 = vmatpush.bf16.msra.mxu0 %v1266_v29  ;;  %v1265_v1 = vld [vmem:[%s2667_s4 + $0x8] sm:$0xff]  ;;  %v2243_v17 = vld [vmem:[#allocation2 + $0x70] sm:$0xff]  ;;  %v2250_v52 = vld [vmem:[%s2669_s6] ss:$0 sm:$0xff] }
  0xa6   :  { %2721 = vst [vmem:[#allocation40_spill] sm:$0xff] %v2210_v43  ;;  %v681_v27 = vsel %vm666_vm1, %v2243_v17, %v1335_v49  ;;  %v2723_v43 = vmov 0.0   ;;  %v1020_v49 = vmax.f32 %v1912_v36, %v2051_v50 }
  0xa7   :  { %2722 = vst [vmem:[#allocation41_spill] sm:$0xff] %v2213_v2  ;;  %1563 = vrot.lane.b32.xlu1 %v1562_v60, %s1713_s27  ;;  %v1001_v60 = vmax.f32 %v96_v61, %v1817_v14  ;;  %v2245_v14 = vld [vmem:[#allocation2 + $0x78] sm:$0xff] }
  0xa8   :  { %590 = vrot.lane.b32.xlu0 %v1905_v32, %s1714_s28  ;;  %1259 = vmatmul.msk.bf16.gmra.mxu1 %vm666_vm1, %v792_v20  ;;  %v2235_v47 = vpop.permute.xlu2 %1413  ;;  %v794_v32 = vpack.c.bf16 %v1945_v53, %v2723_v43 }
  0xa9   :  { %v2223_v45 = vpop.permute.xlu1 %1363  ;;  %1279 = vmatpush.bf16.msra.mxu2 %v1265_v1  ;;  %907 = vmatpush.bf16.msra.mxu0 %v1265_v1  ;;  %v1033_v61 = vmax.f32 %v1001_v60, %v1017_v42  ;;  %v682_v1 = vsel %vm666_vm1, %v2245_v14, %v1336_v26 }
  0xaa   :  { %v2228_v10 = vpop.permute.xlu0 %1358 }
  0xab   :  { %v1053_v60 = vmul.f32 %v2250_v52, %v1033_v61 }
  0xad   :  { %1280 = vmatpush.bf16.msra.mxu2 %v1264_v39  ;;  %908 = vmatpush.bf16.msra.mxu0 %v1264_v39  ;;  %v1004_v39 = vmax.f32 %v2181_v51, %v1794_v4  ;;  %v1073_v2 = vadd.f32 %v2255_v37, %v1053_v60 }
  0xaf   :  { %1107 = vrot.lane.b32.xlu1 %v1073_v2, %s1708_s3  ;;  %v102_v2 = vld [vmem:[#allocation2 + $0x40] sm:$0xff] }
  0xb0   :  { %v2275_v26 = vpop.permute.xlu2 %1428 }
  0xb1   :  { %v2241_v13 = vpop.permute.xlu1 %1378 }
  0xb2   :  { %v1374_v29 = vpop.permute.xlu0 %1373 }
  0xb3   :  { %v1376_v20 = vunpack.i.h.bf16 %v1374_v29  ;;  %v1375_v18 = vunpack.i.l.bf16 %v1374_v29 }
  0xb5   :  { %v2265_v42 = vsel %vm683_vm2, %v681_v27, %v1375_v18  ;;  %v2268_v29 = vsel %vm683_vm2, %v682_v1, %v1376_v20  ;;  %v1036_v18 = vmax.f32 %v1004_v39, %v1020_v49  ;;  %v2279_v20 = vld [vmem:[#allocation2 + $0x8] sm:$0xff]  ;;  %v1023_v49 = vmax.f32 %v1901_v21, %v1922_v40 }
  0xb6   :  { %v1000_v1 = vmax.f32 %v2279_v20, %v1801_v7  ;;  %v1360_v21 = vunpack.i.l.bf16 %v2228_v10 }
  0xb7   :  { %v1056_v60 = vmul.f32 %v2250_v52, %v1036_v18  ;;  %v94_v18 = vld [vmem:[#allocation2] sm:$0xff] }
  0xb8   :  { %1260 = vmatmul.msk.bf16.gmra.mxu1 %vm666_vm1, %v794_v32  ;;  %v1007_v32 = vmax.f32 %v102_v2, %v1786_v0  ;;  %v2724_v0 = vmax.f32 %v1835_v24, %v1837_v25  ;;  %v2316_v40 = vpop.permute.xlu2 %1443  ;;  %v1003_v24 = vmax.f32 %v2179_v5, %v1792_v3  ;;  %v999_v25 = vmax.f32 %v94_v18, %v1798_v6 }
  0xb9   :  { %v1394_v61 = vpop.permute.xlu1 %1393  ;;  %v1400_v3 = vunpack.i.l.bf16 %v2207_v8  ;;  %v1022_v5 = vmax.f32 %v1907_v33, %v2117_v30  ;;  %v796_v30 = vpack.c.bf16 %v1979_v22, %v1948_v54  ;;  %v2725_v33 = vmax.f32 %v1840_v28, %v1844_v31 }
  0xba   :  { %v1396_v4 = vunpack.i.h.bf16 %v1394_v61  ;;  %v1395_v51 = vunpack.i.l.bf16 %v1394_v61  ;;  %v1389_v27 = vpop.permute.xlu0 %1388  ;;  %v1032_v7 = vmax.f32 %v1000_v1, %v2724_v0  ;;  %v1002_v1 = vmax.f32 %v2187_v58, %v1819_v15 }
  0xbb   :  { %v1391_v36 = vunpack.i.h.bf16 %v1389_v27  ;;  %v1390_v53 = vunpack.i.l.bf16 %v1389_v27  ;;  %v1361_v27 = vunpack.i.h.bf16 %v2228_v10  ;;  %v1300_v58 = vunpack.i.l.bf16 %v2089_v55  ;;  %1261 = vmatmul.msk.bf16.vlgmr.msra.gmra.mxu3 %vm666_vm1, %v796_v30 }
  0xbc   :  { %v2283_v43 = vsel %vm700_vm3, %v2130_v62, %v1395_v51  ;;  %v2287_v50 = vsel %vm700_vm3, %v2133_v23, %v1396_v4  ;;  %v1076_v23 = vadd.f32 %v2255_v37, %v1056_v60  ;;  %v1320_v4 = vunpack.i.l.bf16 %v2010_v56 }
  0xbd   :  { %v2295_v39 = vsel %vm700_vm3, %v2199_v44, %v1390_v53  ;;  %v2299_v62 = vsel %vm700_vm3, %v2202_v41, %v1391_v36  ;;  %v1321_v44 = vunpack.i.h.bf16 %v2010_v56  ;;  %v1039_v51 = vmax.f32 %v1007_v32, %v1023_v49  ;;  %v2312_v41 = vld [vmem:[#allocation2 + $0x48] sm:$0xff] }
  0xbe   :  { %1113 = vrot.lane.b32.xlu1 %v1076_v23, %s1708_s3  ;;  %v1052_v53 = vmul.f32 %v2250_v52, %v1032_v7  ;;  %v1006_v56 = vmax.f32 %v2106_v46, %v1812_v12  ;;  %v675_v32 = vsel %vm666_vm1, %v102_v2, %v1320_v4  ;;  %v1401_v49 = vunpack.i.h.bf16 %v2207_v8 }
  0xbf   :  { %v1059_v10 = vmul.f32 %v2250_v52, %v1039_v51  ;;  %v676_v23 = vsel %vm666_vm1, %v2312_v41, %v1321_v44  ;;  %v692_v6 = vsel %vm683_vm2, %v675_v32, %v1360_v21  ;;  %v1019_v46 = vmax.f32 %v1910_v34, %v2049_v16 }
  0xc0   :  { %v1072_v60 = vadd.f32 %v2255_v37, %v1052_v53  ;;  %v693_v12 = vsel %vm683_vm2, %v676_v23, %v1361_v27  ;;  %v1416_v2 = vunpack.i.h.bf16 %v2235_v47  ;;  %v1415_v8 = vunpack.i.l.bf16 %v2235_v47  ;;  %v2365_v22 = vpop.permute.xlu2 %1458 }
  0xc1   :  { %v2304_v61 = vpop.permute.xlu1 %1408  ;;  %v1079_v15 = vadd.f32 %v2255_v37, %v1059_v10  ;;  %v1035_v7 = vmax.f32 %v1003_v24, %v1019_v46  ;;  %v709_v44 = vsel %vm700_vm3, %v692_v6, %v1400_v3  ;;  %v710_v34 = vsel %vm700_vm3, %v693_v12, %v1401_v49 }
  0xc2   :  { %v2318_v36 = vpop.permute.xlu0 %1403  ;;  %1105 = vrot.lane.b32.xlu0 %v1072_v60, %s1708_s3  ;;  %v1031_v16 = vmax.f32 %v999_v25, %v2725_v33  ;;  %v1431_v47 = vunpack.i.h.bf16 %v2275_v26  ;;  %v1430_v53 = vunpack.i.l.bf16 %v2275_v26  ;;  %v726_v28 = vsel %vm717_vm4, %v709_v44, %v1415_v8  ;;  %v104_v33 = vld [vmem:[#allocation2 + $0x50] sm:$0xff] }
  0xc3   :  { %v1055_v21 = vmul.f32 %v2250_v52, %v1035_v7  ;;  %v727_v31 = vsel %vm717_vm4, %v710_v34, %v1416_v2  ;;  %v1301_v10 = vunpack.i.h.bf16 %v2089_v55  ;;  %v1340_v3 = vunpack.i.l.bf16 %v2072_v35 }
  0xc4   :  { %v1051_v54 = vmul.f32 %v2250_v52, %v1031_v16  ;;  %v1018_v2 = vmax.f32 %v1890_v19, %v1995_v38  ;;  %v1341_v8 = vunpack.i.h.bf16 %v2072_v35  ;;  %v1380_v7 = vunpack.i.l.bf16 %v2241_v13 }
  0xc5   :  { %v1075_v25 = vadd.f32 %v2255_v37, %v1055_v21  ;;  %v1038_v30 = vmax.f32 %v1006_v56, %v1022_v5  ;;  %v1461_v26 = vunpack.i.h.bf16 %v2365_v22 }
  0xc6   :  { %1119 = vrot.lane.b32.xlu1 %v1079_v15, %s1708_s3  ;;  %v1071_v49 = vadd.f32 %v2255_v37, %v1051_v54  ;;  %v667_v15 = vsel %vm666_vm1, %v94_v18, %v1300_v58  ;;  %v668_v18 = vsel %vm666_vm1, %v2279_v20, %v1301_v10  ;;  %v1381_v58 = vunpack.i.h.bf16 %v2241_v13 }
  0xc7   :  { %v1034_v16 = vmax.f32 %v1002_v1, %v1018_v2  ;;  %v684_v19 = vsel %vm683_vm2, %v667_v15, %v1340_v3  ;;  %v1058_v38 = vmul.f32 %v2250_v52, %v1038_v30  ;;  %v1325_v20 = vunpack.i.l.bf16 %v2041_v48  ;;  %v2729_v15 = vld [vmem:[#allocation16_spill] sm:$0xff] }
  0xc8   :  { %1103 = vrot.lane.b32.xlu2 %v1071_v49, %s1708_s3  ;;  %v685_v13 = vsel %vm683_vm2, %v668_v18, %v1341_v8  ;;  %v1326_v54 = vunpack.i.h.bf16 %v2041_v48  ;;  %v105_v49 = vld [vmem:[#allocation2 + $0x58] sm:$0xff]  ;;  %v1365_v3 = vunpack.i.l.bf16 %v2223_v45  ;;  %v2728_v48 = vld [vmem:[#allocation20_spill] sm:$0xff]  ;;  %v1405_v2 = vunpack.i.l.bf16 %v2318_v36 }
  0xc9   :  { %v2346_v0 = vpop.permute.xlu1 %1423  ;;  %v1054_v21 = vmul.f32 %v2250_v52, %v1034_v16  ;;  %v1078_v1 = vadd.f32 %v2255_v37, %v1058_v38  ;;  %v1366_v18 = vunpack.i.h.bf16 %v2223_v45 }
  0xca   :  { %v1426_v4 = vunpack.i.h.bf16 %v2346_v0  ;;  %v1425_v51 = vunpack.i.l.bf16 %v2346_v0  ;;  %v1419_v27 = vpop.permute.xlu0 %1418  ;;  %1111 = vrot.lane.b32.xlu0 %v1075_v25, %s1708_s3  ;;  %v2726_v25 = vld [vmem:[#allocation23_spill] sm:$0xff]  ;;  %v678_v30 = vsel %vm666_vm1, %v105_v49, %v1326_v54 }
  0xcb   :  { %v1421_v24 = vunpack.i.h.bf16 %v1419_v27  ;;  %v1420_v60 = vunpack.i.l.bf16 %v1419_v27  ;;  %v1025_v10 = vmax.f32 %v2726_v25, %v1964_v63  ;;  %v2734_v25 = vld [vmem:[#allocation26_spill] sm:$0xff] }
  0xcd   :  { %v743_v32 = vsel %vm734_vm5, %v726_v28, %v1420_v60  ;;  %v744_v23 = vsel %vm734_vm5, %v727_v31, %v1421_v24  ;;  %v1074_v60 = vadd.f32 %v2255_v37, %v1054_v21  ;;  %v2405_v28 = vpop.permute.xlu2 %1473 }
  0xce   :  { %v760_v6 = vsel %vm751_vm6, %v743_v32, %v1425_v51  ;;  %v761_v12 = vsel %vm751_vm6, %v744_v23, %v1426_v4  ;;  %v1005_v4 = vmax.f32 %v2104_v59, %v1810_v11  ;;  %v702_v11 = vsel %vm700_vm3, %v685_v13, %v1381_v58  ;;  %v2727_v32 = vld [vmem:[#allocation15_spill] sm:$0xff]  ;;  %v2730_v13 = vld [vmem:[#allocation25_spill] sm:$0xff] }
  0xcf   :  { %v777_v55 = vsel %vm768_vm7, %v760_v6, %v1430_v53  ;;  %v778_v46 = vsel %vm768_vm7, %v761_v12, %v1431_v47  ;;  %v1009_v47 = vmax.f32 %v104_v33, %v1806_v9  ;;  %v701_v9 = vsel %vm700_vm3, %v684_v19, %v1380_v7 }
  0xd0   :  { %v793_v34 = vpack.c.bf16 %v778_v46, %v777_v55  ;;  %v1008_v23 = vmax.f32 %v2312_v41, %v2727_v32  ;;  %1109 = vrot.lane.b32.xlu2 %v1074_v60, %s1708_s3  ;;  %v1021_v12 = vmax.f32 %v2728_v48, %v2125_v57  ;;  %v1010_v55 = vmax.f32 %v105_v49, %v2729_v15 }
  0xd1   :  { %v1439_v44 = vpop.permute.xlu1 %1438  ;;  %v1445_v46 = vunpack.i.l.bf16 %v2316_v40  ;;  %v1041_v8 = vmax.f32 %v1009_v47, %v1025_v10  ;;  %v677_v41 = vsel %vm666_vm1, %v104_v33, %v1325_v20  ;;  %v1406_v47 = vunpack.i.h.bf16 %v2318_v36  ;;  %v2735_v10 = vld [vmem:[#allocation32_spill] sm:$0xff] }
  0xd2   :  { %v1434_v35 = vpop.permute.xlu0 %1433  ;;  %929 = vmatmul.bf16.vlgmr.msra.gmra.mxu2 %v793_v34  ;;  %v1440_v27 = vunpack.i.l.bf16 %v1439_v44  ;;  %v1441_v59 = vunpack.i.h.bf16 %v1439_v44  ;;  %1117 = vrot.lane.b32.xlu0 %v1078_v1, %s1708_s3  ;;  %v1037_v34 = vmax.f32 %v1005_v4, %v1021_v12  ;;  %v694_v19 = vsel %vm683_vm2, %v677_v41, %v1365_v3 }
  0xd3   :  { %v1436_v56 = vunpack.i.h.bf16 %v1434_v35  ;;  %v1435_v5 = vunpack.i.l.bf16 %v1434_v35  ;;  %v1061_v16 = vmul.f32 %v2250_v52, %v1041_v8  ;;  %v1460_v33 = vunpack.i.l.bf16 %v2365_v22 }
  0xd4   :  { %v711_v4 = vsel %vm700_vm3, %v694_v19, %v1405_v2  ;;  %v798_v32 = vpack.c.bf16 %v2735_v10, %v2734_v25  ;;  %v1446_v3 = vunpack.i.h.bf16 %v2316_v40  ;;  %v1570_v25 = vld [vmem:[#allocation5 + $0x68] sm:$0xff] }
  0xd5   :  { %v718_v24 = vsel %vm717_vm4, %v701_v9, %v1435_v5  ;;  %v719_v31 = vsel %vm717_vm4, %v702_v11, %v1436_v56  ;;  %v1081_v45 = vadd.f32 %v2255_v37, %v1061_v16  ;;  %v695_v5 = vsel %vm683_vm2, %v678_v30, %v1366_v18  ;;  %v2731_v9 = vld [vmem:[#allocation24_spill] sm:$0xff] }
  0xd6   :  { %v735_v6 = vsel %vm734_vm5, %v718_v24, %v1440_v27  ;;  %v736_v44 = vsel %vm734_vm5, %v719_v31, %v1441_v59  ;;  %v1057_v27 = vmul.f32 %v2250_v52, %v1037_v34  ;;  %v1026_v1 = vmax.f32 %v2731_v9, %v2730_v13  ;;  %v2732_v59 = vld [vmem:[#allocation21_spill] sm:$0xff]  ;;  %v2733_v24 = vld [vmem:[#allocation19_spill] sm:$0xff]  ;;  %1262 = vmatmul.msk.bf16.gmra.mxu3 %vm666_vm1, %v798_v32 }
  0xd7   :  { %v752_v57 = vsel %vm751_vm6, %v735_v6, %v1425_v51  ;;  %v753_v38 = vsel %vm751_vm6, %v736_v44, %v1445_v46  ;;  %v712_v11 = vsel %vm700_vm3, %v695_v5, %v1406_v47  ;;  %v1024_v60 = vmax.f32 %v2733_v24, %v2732_v59  ;;  %v2737_v47 = vld [vmem:[#allocation40_spill] sm:$0xff] }
  0xd8   :  { %v769_v56 = vsel %vm768_vm7, %v752_v57, %v1430_v53  ;;  %v1077_v20 = vadd.f32 %v2255_v37, %v1057_v27  ;;  %v2450_v53 = vpop.permute.xlu2 %1488  ;;  %v1042_v49 = vmax.f32 %v1010_v55, %v1026_v1  ;;  %v1475_v16 = vunpack.i.l.bf16 %v2405_v28 }
  0xd9   :  { %v1454_v63 = vpop.permute.xlu1 %1453  ;;  %v1040_v48 = vmax.f32 %v1008_v23, %v1024_v60  ;;  %v1410_v24 = vunpack.i.l.bf16 %v2304_v61 }
  0xda   :  { %v1455_v7 = vunpack.i.l.bf16 %v1454_v63  ;;  %v1449_v58 = vpop.permute.xlu0 %1448  ;;  %v1456_v0 = vunpack.i.h.bf16 %v1454_v63  ;;  %1123 = vrot.lane.b32.xlu0 %v1081_v45, %s1708_s3  ;;  %1115 = vrot.lane.b32.xlu2 %v1077_v20, %s1708_s3  ;;  %v1062_v22 = vmul.f32 %v2250_v52, %v1042_v49  ;;  %v2738_v45 = vld [vmem:[#allocation41_spill] sm:$0xff] }
  0xdb   :  { %v1450_v35 = vunpack.i.l.bf16 %v1449_v58  ;;  %v1060_v63 = vmul.f32 %v2250_v52, %v1040_v48  ;;  %v1451_v8 = vunpack.i.h.bf16 %v1449_v58  ;;  %v1476_v58 = vunpack.i.h.bf16 %v2405_v28  ;;  %v2740_v49 = vld [vmem:[#allocation33_spill] sm:$0xff]  ;;  %v2742_v48 = vld [vmem:[#allocation27_spill] sm:$0xff] }
  0xdc   :  { %v728_v51 = vsel %vm717_vm4, %v711_v4, %v1455_v7  ;;  %v729_v6 = vsel %vm717_vm4, %v712_v11, %v1456_v0  ;;  %v1082_v55 = vadd.f32 %v2255_v37, %v1062_v22  ;;  %v2736_v7 = vld [vmem:[#allocation37_spill] sm:$0xff]  ;;  %v1490_v0 = vunpack.i.l.bf16 %v2450_v53 }
  0xdd   :  { %v770_v36 = vsel %vm768_vm7, %v753_v38, %v1450_v35  ;;  %v745_v31 = vsel %vm734_vm5, %v728_v51, %v1460_v33  ;;  %v746_v41 = vsel %vm734_vm5, %v729_v6, %v1461_v26  ;;  %v1080_v23 = vadd.f32 %v2255_v37, %v1060_v63  ;;  %v2744_v63 = vld [vmem:[#allocation38_spill] sm:$0xff] }
  0xde   :  { %v785_v21 = vpack.c.bf16 %v770_v36, %v769_v56  ;;  %v762_v2 = vsel %vm751_vm6, %v745_v31, %v1446_v3  ;;  %v1385_v44 = vunpack.i.l.bf16 %v2736_v7  ;;  %1125 = vrot.lane.b32.xlu1 %v1082_v55, %s1708_s3  ;;  %v1386_v18 = vunpack.i.h.bf16 %v2736_v7  ;;  %v2741_v3 = vld [vmem:[#allocation34_spill] sm:$0xff] }
  0xdf   :  { %v779_v34 = vsel %vm768_vm7, %v762_v2, %v1451_v8  ;;  %v1411_v31 = vunpack.i.h.bf16 %v2304_v61  ;;  %v800_v6 = vpack.c.bf16 %v2741_v3, %v2740_v49  ;;  %v713_v8 = vsel %vm700_vm3, %v2744_v63, %v1410_v24  ;;  %v2745_v61 = vld [vmem:[#allocation39_spill] sm:$0xff] }
  0xe0   :  { %909 = vmatmul.bf16.vlgmr.msra.gmra.mxu0 %v785_v21  ;;  %v703_v33 = vsel %vm700_vm3, %v2737_v47, %v1385_v44  ;;  %v2476_v35 = vpop.permute.xlu2 %1503  ;;  %v704_v27 = vsel %vm700_vm3, %v2738_v45, %v1386_v18 }
  0xe1   :  { %v1469_v54 = vpop.permute.xlu1 %1468  ;;  %v720_v28 = vsel %vm717_vm4, %v703_v33, %v1475_v16  ;;  %v721_v36 = vsel %vm717_vm4, %v704_v27, %v1476_v58  ;;  %v714_v55 = vsel %vm700_vm3, %v2745_v61, %v1411_v31  ;;  %v1572_v27 = vld [vmem:[#allocation5 + $0x60] sm:$0xff] }
  0xe2   :  { %v1470_v12 = vunpack.i.l.bf16 %v1469_v54  ;;  %v1464_v15 = vpop.permute.xlu0 %1463  ;;  %1121 = vrot.lane.b32.xlu2 %v1080_v23, %s1708_s3  ;;  %v1471_v21 = vunpack.i.h.bf16 %v1469_v54  ;;  %v2739_v54 = vld [vmem:[#allocation36_spill] sm:$0xff] }
  0xe3   :  { %v1465_v46 = vunpack.i.l.bf16 %v1464_v15  ;;  %v1466_v5 = vunpack.i.h.bf16 %v1464_v15  ;;  %v1012_v10 = vmax.f32 %v2739_v54, %v1570_v25 }
  0xe5   :  { %v763_v40 = vsel %vm751_vm6, %v746_v41, %v1465_v46 }
  0xe6   :  { %v780_v30 = vsel %vm768_vm7, %v763_v40, %v1470_v12  ;;  %v2743_v12 = vld [vmem:[#allocation22_spill] sm:$0xff]  ;;  %1263 = vmatmul.msk.bf16.gmra.mxu3 %vm666_vm1, %v800_v6 }
  0xe7   :  { %v795_v57 = vpack.c.bf16 %v780_v30, %v779_v34  ;;  %v1028_v15 = vmax.f32 %v2743_v12, %v2742_v48  ;;  %v1505_v30 = vunpack.i.l.bf16 %v2476_v35 }
  0xe8   :  { %v1519_v41 = vpop.permute.xlu2 %1518 }
  0xe9   :  { %v1484_v19 = vpop.permute.xlu1 %1483  ;;  %934 = vmatmul.bf16.gmra.mxu2 %v795_v57  ;;  %v1044_v34 = vmax.f32 %v1012_v10, %v1028_v15  ;;  %v1521_v54 = vunpack.i.h.bf16 %v1519_v41 }
  0xea   :  { %v1485_v4 = vunpack.i.l.bf16 %v1484_v19  ;;  %v1479_v38 = vpop.permute.xlu0 %1478  ;;  %v1486_v18 = vunpack.i.h.bf16 %v1484_v19 }
  0xeb   :  { %v1481_v51 = vunpack.i.h.bf16 %v1479_v38  ;;  %v1480_v56 = vunpack.i.l.bf16 %v1479_v38  ;;  %v1064_v47 = vmul.f32 %v2250_v52, %v1044_v34  ;;  %v1571_v38 = vld [vmem:[#allocation5 + $0x70] sm:$0xff] }
  0xec   :  { %v1013_v45 = vmax.f32 %v2243_v17, %v1571_v38 }
  0xed   :  { %v737_v20 = vsel %vm734_vm5, %v720_v28, %v1480_v56  ;;  %v738_v13 = vsel %vm734_vm5, %v721_v36, %v1481_v51  ;;  %v1491_v56 = vunpack.i.h.bf16 %v2450_v53  ;;  %v1520_v36 = vunpack.i.l.bf16 %v1519_v41  ;;  %v2748_v53 = vld [vmem:[#allocation30_spill] sm:$0xff] }
  0xee   :  { %v754_v9 = vsel %vm751_vm6, %v737_v20, %v1466_v5  ;;  %v755_v1 = vsel %vm751_vm6, %v738_v13, %v1485_v4  ;;  %v1084_v5 = vadd.f32 %v2255_v37, %v1064_v47  ;;  %v1573_v41 = vld [vmem:[#allocation5 + $0x78] sm:$0xff] }
  0xef   :  { %v771_v11 = vsel %vm768_vm7, %v754_v9, %v1471_v21  ;;  %v772_v59 = vsel %vm768_vm7, %v755_v1, %v1490_v0  ;;  %v2746_v0 = vld [vmem:[#allocation35_spill] sm:$0xff]  ;;  %v1014_v61 = vmax.f32 %v2245_v14, %v1573_v41 }
  0xf0   :  { %v787_v26 = vpack.c.bf16 %v772_v59, %v771_v11  ;;  %v1011_v51 = vmax.f32 %v2746_v0, %v1572_v27  ;;  %v1534_v17 = vpop.permute.xlu2 %1533  ;;  %1129 = vrot.lane.b32.xlu0 %v1084_v5, %s1708_s3  ;;  %v2747_v11 = vld [vmem:[#allocation28_spill] sm:$0xff] }
  0xf1   :  { %v1499_v60 = vpop.permute.xlu1 %1498  ;;  %v2749_v59 = vmax.f32 %v2747_v11, %v2748_v53  ;;  %v1535_v34 = vunpack.i.l.bf16 %v1534_v17 }
  0xf2   :  { %v1494_v32 = vpop.permute.xlu0 %1493  ;;  %914 = vmatmul.bf16.gmra.mxu0 %v787_v26  ;;  %v1500_v22 = vunpack.i.l.bf16 %v1499_v60  ;;  %v1501_v40 = vunpack.i.h.bf16 %v1499_v60  ;;  %v2750_v60 = vld [vmem:[#allocation17_spill] sm:$0xff]  ;;  %v2751_v26 = vld [vmem:[#allocation18_spill] sm:$0xff] }
  0xf3   :  { %v1496_v46 = vunpack.i.h.bf16 %v1494_v32  ;;  %v1495_v2 = vunpack.i.l.bf16 %v1494_v32  ;;  %v1045_v24 = vmax.f32 %v1013_v45, %v2749_v59  ;;  %v2752_v31 = vmax.f32 %v2750_v60, %v2751_v26 }
  0xf4   :  { %v1506_v32 = vunpack.i.h.bf16 %v2476_v35  ;;  %v715_v14 = vsel %vm700_vm3, %v2265_v42, %v1535_v34 }
  0xf5   :  { %v730_v23 = vsel %vm717_vm4, %v713_v8, %v1495_v2  ;;  %v731_v7 = vsel %vm717_vm4, %v714_v55, %v1496_v46  ;;  %v1043_v25 = vmax.f32 %v1011_v51, %v2752_v31  ;;  %v1065_v3 = vmul.f32 %v2250_v52, %v1045_v24  ;;  %v2530_v15 = vpop.f32.mrf.mxu1 }
  0xf6   :  { %v747_v44 = vsel %vm734_vm5, %v730_v23, %v1500_v22  ;;  %v748_v16 = vsel %vm734_vm5, %v731_v7, %v1501_v40 }
  0xf7   :  { %v764_v4 = vsel %vm751_vm6, %v747_v44, %v1486_v18  ;;  %v765_v19 = vsel %vm751_vm6, %v748_v16, %v1505_v30  ;;  %v1063_v6 = vmul.f32 %v2250_v52, %v1043_v25  ;;  %v1085_v2 = vadd.f32 %v2255_v37, %v1065_v3  ;;  %v2754_v16 = vld [vmem:[#allocation31_spill] sm:$0xff] }
  0xf8   :  { %v781_v13 = vsel %vm768_vm7, %v764_v4, %v1491_v56  ;;  %v1549_v23 = vpop.permute.xlu2 %1548  ;;  %v1536_v44 = vunpack.i.h.bf16 %v1534_v17 }
  0xf9   :  { %v1514_v57 = vpop.permute.xlu1 %1513  ;;  %v1083_v63 = vadd.f32 %v2255_v37, %v1063_v6  ;;  %1131 = vrot.lane.b32.xlu1 %v1085_v2, %s1708_s3 }
  0xfa   :  { %v1515_v58 = vunpack.i.l.bf16 %v1514_v57  ;;  %v1509_v33 = vpop.permute.xlu0 %1508  ;;  %v1516_v21 = vunpack.i.h.bf16 %v1514_v57  ;;  %v716_v27 = vsel %vm700_vm3, %v2268_v29, %v1536_v44 }
  0xfb   :  { %v1510_v28 = vunpack.i.l.bf16 %v1509_v33  ;;  %v1511_v8 = vunpack.i.h.bf16 %v1509_v33  ;;  %1127 = vrot.lane.b32.xlu2 %v1083_v63, %s1708_s3 }
  0xfc   :  { %v722_v20 = vsel %vm717_vm4, %v2295_v39, %v1515_v58  ;;  %v723_v49 = vsel %vm717_vm4, %v2299_v62, %v1516_v21  ;;  %v2753_v58 = vld [vmem:[#allocation29_spill] sm:$0xff] }
  0xfd   :  { %v782_v9 = vsel %vm768_vm7, %v765_v19, %v1510_v28  ;;  %v739_v39 = vsel %vm734_vm5, %v722_v20, %v1520_v36  ;;  %v740_v35 = vsel %vm734_vm5, %v723_v49, %v1521_v54  ;;  %v2755_v47 = vmax.f32 %v2753_v58, %v2754_v16  ;;  %v2549_v0 = vpop.f32.mrf.mxu1 }
  0xfe   :  { %v797_v1 = vpack.c.bf16 %v782_v9, %v781_v13  ;;  %v756_v46 = vsel %vm751_vm6, %v739_v39, %v1506_v32  ;;  %v1550_v19 = vunpack.i.l.bf16 %v1549_v23 }
  0xff   :  { %v773_v55 = vsel %vm768_vm7, %v756_v46, %v1511_v8  ;;  %v1046_v33 = vmax.f32 %v1014_v61, %v2755_v47 }
 0x100   :  { %939 = vmatmul.bf16.gmra.mxu2 %v797_v1  ;;  %v1559_v13 = vpop.permute.xlu2 %1558 }
 0x101   :  { %v1529_v10 = vpop.permute.xlu1 %1528  ;;  %v1066_v51 = vmul.f32 %v2250_v52, %v1046_v33  ;;  %v1560_v59 = vunpack.i.l.bf16 %v1559_v13  ;;  %v1561_v26 = vunpack.i.h.bf16 %v1559_v13 }
 0x102   :  { %v1530_v48 = vunpack.i.l.bf16 %v1529_v10  ;;  %v1524_v12 = vpop.permute.xlu0 %1523  ;;  %v1531_v9 = vunpack.i.h.bf16 %v1529_v10  ;;  %v1551_v10 = vunpack.i.h.bf16 %v1549_v23  ;;  %v2589_v23 = vld [vmem:[%s2668_s5] ss:$0 sm:$0xff]  ;;  %s1716_s5 = smov [#allocation10]  }
 0x103   :  { %v1525_v22 = vunpack.i.l.bf16 %v1524_v12  ;;  %v1526_v36 = vunpack.i.h.bf16 %v1524_v12  ;;  %v1086_v21 = vadd.f32 %v2255_v37, %v1066_v51 }
 0x105   :  { %v757_v62 = vsel %vm751_vm6, %v740_v35, %v1525_v22  ;;  %1133 = vrot.lane.b32.xlu2 %v1086_v21, %s1708_s3  ;;  %v2564_v31 = vpop.f32.mrf.mxu1  ;;  %s1203_s3 = sshll.u32 %s1716_s5, 4  ;;  %s1204_s3 = int_to_ptr.vmem [resolvable:$true] %s1203_s3 }
 0x106   :  { %v774_v40 = vsel %vm768_vm7, %v757_v62, %v1530_v48 }
 0x107   :  { %v789_v7 = vpack.c.bf16 %v774_v40, %v773_v55 }
 0x109   :  { %v1544_v30 = vpop.permute.xlu1 %1543  ;;  %919 = vmatmul.bf16.gmra.mxu0 %v789_v7 }
 0x10a   :  { %v1545_v18 = vunpack.i.l.bf16 %v1544_v30  ;;  %v1539_v57 = vpop.permute.xlu0 %1538  ;;  %v1546_v4 = vunpack.i.h.bf16 %v1544_v30 }
 0x10b   :  { %v1541_v38 = vunpack.i.h.bf16 %v1539_v57  ;;  %v1540_v45 = vunpack.i.l.bf16 %v1539_v57 }
 0x10d   :  { %v732_v56 = vsel %vm717_vm4, %v715_v14, %v1540_v45  ;;  %v733_v28 = vsel %vm717_vm4, %v716_v27, %v1541_v38  ;;  %v2574_v2 = vpop.f32.mrf.mxu1 }
 0x10e   :  { %v749_v5 = vsel %vm734_vm5, %v732_v56, %v1545_v18  ;;  %v750_v20 = vsel %vm734_vm5, %v733_v28, %v1546_v4 }
 0x10f   :  { %v766_v29 = vsel %vm751_vm6, %v749_v5, %v1526_v36  ;;  %v767_v1 = vsel %vm751_vm6, %v750_v20, %v1550_v19 }
 0x110   :  { %v783_v24 = vsel %vm768_vm7, %v766_v29, %v1531_v9 }
 0x111   :  { %v1554_v42 = vpop.permute.xlu1 %1553 }
 0x112   :  { %v1555_v52 = vunpack.i.l.bf16 %v1554_v42  ;;  %v650_v17 = vpop.permute.xlu0 %649  ;;  %v1556_v11 = vunpack.i.h.bf16 %v1554_v42 }
 0x113   :  { %v784_v53 = vsel %vm768_vm7, %v767_v1, %v650_v17 }
 0x114   :  { %v724_v37 = vsel %vm717_vm4, %v2283_v43, %v1555_v52  ;;  %v799_v60 = vpack.c.bf16 %v784_v53, %v783_v24  ;;  %v725_v54 = vsel %vm717_vm4, %v2287_v50, %v1556_v11 }
 0x115   :  { %v741_v25 = vsel %vm734_vm5, %v724_v37, %v1560_v59  ;;  %v742_v6 = vsel %vm734_vm5, %v725_v54, %v1561_v26  ;;  %v2576_v50 = vpop.f32.mrf.mxu1 }
 0x116   :  { %944 = vmatmul.bf16.gmra.mxu2 %v799_v60  ;;  %v758_v48 = vsel %vm751_vm6, %v741_v25, %v1551_v10 }
 0x119   :  { %v1564_v39 = vpop.permute.xlu1 %1563 }
 0x11a   :  { %v1566_v32 = vunpack.i.h.bf16 %v1564_v39  ;;  %v1565_v49 = vunpack.i.l.bf16 %v1564_v39  ;;  %v591_v3 = vpop.permute.xlu0 %590 }
 0x11b   :  { %v759_v43 = vsel %vm751_vm6, %v742_v6, %v591_v3 }
 0x11c   :  { %v775_v12 = vsel %vm768_vm7, %v758_v48, %v1565_v49  ;;  %v776_v22 = vsel %vm768_vm7, %v759_v43, %v1566_v32 }
 0x11d   :  { %v791_v46 = vpack.c.bf16 %v776_v22, %v775_v12  ;;  %v2578_v63 = vpop.f32.mrf.mxu1 }
 0x11f   :  { %924 = vmatmul.bf16.gmra.mxu0 %v791_v46 }
 0x121   :  { %v1108_v62 = vpop.permute.xlu1 %1107 }
 0x122   :  { %v1104_v35 = vpop.permute.xlu2 %1103 }
 0x125   :  { %v2580_v8 = vpop.f32.mrf.mxu1 }
 0x12a   :  { %v1110_v61 = vpop.permute.xlu2 %1109 }
 0x12d   :  { %v2582_v41 = vpop.f32.mrf.mxu1 }
 0x130   :  { %v2584_v55 = vpop.permute.xlu1 %1113 }
 0x134   :  { %v1106_v40 = vpop.permute.xlu0 %1105  ;;  %v2591_v34 = vpop.permute.xlu2 %1115 }
 0x135   :  { %v979_v7 = vpop.f32.mrf.mxu1 }
 0x138   :  { %v1120_v18 = vpop.permute.xlu1 %1119 }
 0x13c   :  { %v2595_v16 = vpop.permute.xlu0 %1111  ;;  %v1122_v27 = vpop.permute.xlu2 %1121 }
 0x13d   :  { %v981_v33 = vpop.f32.mrf.mxu1 }
 0x13e   :  { %v984_v29 = vpop.f32.mrf.mxu3 }
 0x144   :  { %v2603_v21 = vpop.permute.xlu0 %1117 }
 0x146   :  { %v986_v25 = vpop.f32.mrf.mxu3 }
 0x14c   :  { %v1124_v1 = vpop.permute.xlu0 %1123 }
 0x150   :  { %v1126_v39 = vpop.permute.xlu1 %1125 }
 0x155   :  { %v930_v44 = vpop.f32.mrf.mxu2 }
 0x156   :  { %v931_v30 = vadd.f32 %v2589_v23, %v930_v44 }
 0x158   :  { %v980_v57 = vadd.f32 %v979_v7, %v931_v30 }
 0x159   :  { %v989_v22 = vpop.f32.mrf.mxu3 }
 0x15a   :  { %v1159_v58 = vsel %vm666_vm1, %v980_v57, %v1120_v18 }
 0x15b   :  { %v1175_v47 = vmax.f32 %v1159_v58, 0.0 }
 0x15d   :  { %1191 = vst.msk [vmem:[#allocation10 + $0x40] sm:$0xff] %vm683_vm2, %v1175_v47  ;;  %v910_v4 = vpop.f32.mrf.mxu0  ;;  %v932_v38 = vpop.f32.mrf.mxu2 }
 0x15e   :  { %v911_v45 = vadd.f32 %v2589_v23, %v910_v4  ;;  %v933_v14 = vadd.f32 %v2589_v23, %v932_v38 }
 0x160   :  { %v960_v51 = vadd.f32 %v2530_v15, %v911_v45  ;;  %v982_v56 = vadd.f32 %v981_v33, %v933_v14 }
 0x161   :  { %v991_v58 = vpop.f32.mrf.mxu3 }
 0x162   :  { %v1151_v28 = vsel %vm666_vm1, %v960_v51, %v1104_v35  ;;  %v1160_v36 = vsel %vm666_vm1, %v982_v56, %v1122_v27  ;;  %v1130_v4 = vpop.permute.xlu0 %1129 }
 0x163   :  { %v1167_v19 = vmax.f32 %v1151_v28, 0.0  ;;  %v1176_v5 = vmax.f32 %v1160_v36, 0.0 }
 0x165   :  { %1183 = vst.msk [vmem:[#allocation10] sm:$0xff] %vm683_vm2, %v1167_v19  ;;  %v912_v20 = vpop.f32.mrf.mxu0 }
 0x166   :  { %1192 = vst.msk [vmem:[#allocation10 + $0x48] sm:$0xff] %vm683_vm2, %v1176_v5  ;;  %v913_v42 = vadd.f32 %v2589_v23, %v912_v20 }
 0x168   :  { %v962_v13 = vadd.f32 %v2549_v0, %v913_v42 }
 0x169   :  { %v994_v28 = vpop.f32.mrf.mxu3 }
 0x16a   :  { %v1152_v15 = vsel %vm666_vm1, %v962_v13, %v1106_v40 }
 0x16b   :  { %v1168_v9 = vmax.f32 %v1152_v15, 0.0  ;;  %v1132_v5 = vpop.permute.xlu1 %1131 }
 0x16c   :  { %v935_v52 = vpop.f32.mrf.mxu2 }
 0x16d   :  { %1184 = vst.msk [vmem:[#allocation10 + $0x8] sm:$0xff] %vm683_vm2, %v1168_v9  ;;  %v936_v17 = vadd.f32 %v2589_v23, %v935_v52 }
 0x16f   :  { %v985_v11 = vadd.f32 %v984_v29, %v936_v17  ;;  %v915_v53 = vpop.f32.mrf.mxu0 }
 0x170   :  { %v916_v59 = vadd.f32 %v2589_v23, %v915_v53 }
 0x171   :  { %v1161_v24 = vsel %vm666_vm1, %v985_v11, %v1124_v1  ;;  %v996_v1 = vpop.f32.mrf.mxu3 }
 0x172   :  { %v965_v37 = vadd.f32 %v2564_v31, %v916_v59  ;;  %v1177_v60 = vmax.f32 %v1161_v24, 0.0 }
 0x174   :  { %v1153_v0 = vsel %vm666_vm1, %v965_v37, %v1108_v62  ;;  %1193 = vst.msk [vmem:[#allocation10 + $0x50] sm:$0xff] %vm683_vm2, %v1177_v60  ;;  %v937_v26 = vpop.f32.mrf.mxu2  ;;  %v1128_v62 = vpop.permute.xlu2 %1127 }
 0x175   :  { %v1169_v54 = vmax.f32 %v1153_v0, 0.0  ;;  %v938_v10 = vadd.f32 %v2589_v23, %v937_v26 }
 0x177   :  { %1185 = vst.msk [vmem:[#allocation10 + $0x10] sm:$0xff] %vm683_vm2, %v1169_v54  ;;  %v987_v32 = vadd.f32 %v986_v25, %v938_v10  ;;  %v917_v49 = vpop.f32.mrf.mxu0 }
 0x178   :  { %v918_v3 = vadd.f32 %v2589_v23, %v917_v49 }
 0x179   :  { %v1162_v6 = vsel %vm666_vm1, %v987_v32, %v1126_v39 }
 0x17a   :  { %v967_v31 = vadd.f32 %v2574_v2, %v918_v3  ;;  %v1178_v48 = vmax.f32 %v1162_v6, 0.0 }
 0x17c   :  { %v1154_v43 = vsel %vm666_vm1, %v967_v31, %v1110_v61  ;;  %1194 = vst.msk [vmem:[#allocation10 + $0x58] sm:$0xff] %vm683_vm2, %v1178_v48  ;;  %v1134_v11 = vpop.permute.xlu2 %1133 }
 0x17d   :  { %v1170_v12 = vmax.f32 %v1154_v43, 0.0 }
 0x17f   :  { %1186 = vst.msk [vmem:[#allocation10 + $0x18] sm:$0xff] %vm683_vm2, %v1170_v12 }
 0x183   :  { %v940_v46 = vpop.f32.mrf.mxu2 }
 0x184   :  { %v941_v35 = vadd.f32 %v2589_v23, %v940_v46 }
 0x186   :  { %v990_v40 = vadd.f32 %v989_v22, %v941_v35  ;;  %v920_v7 = vpop.f32.mrf.mxu0 }
 0x187   :  { %v921_v44 = vadd.f32 %v2589_v23, %v920_v7 }
 0x188   :  { %v1163_v30 = vsel %vm666_vm1, %v990_v40, %v1128_v62 }
 0x189   :  { %v970_v2 = vadd.f32 %v2576_v50, %v921_v44  ;;  %v1179_v18 = vmax.f32 %v1163_v30, 0.0 }
 0x18b   :  { %v1155_v61 = vsel %vm666_vm1, %v970_v2, %v2595_v16  ;;  %1195 = vst.msk [vmem:[#allocation10 + $0x60] sm:$0xff] %vm683_vm2, %v1179_v18  ;;  %v942_v57 = vpop.f32.mrf.mxu2 }
 0x18c   :  { %v1171_v47 = vmax.f32 %v1155_v61, 0.0  ;;  %v943_v33 = vadd.f32 %v2589_v23, %v942_v57 }
 0x18e   :  { %1187 = vst.msk [vmem:[#allocation10 + $0x20] sm:$0xff] %vm683_vm2, %v1171_v47  ;;  %v992_v38 = vadd.f32 %v991_v58, %v943_v33  ;;  %v922_v45 = vpop.f32.mrf.mxu0 }
 0x18f   :  { %v923_v14 = vadd.f32 %v2589_v23, %v922_v45 }
 0x190   :  { %v1164_v50 = vsel %vm666_vm1, %v992_v38, %v1130_v4 }
 0x191   :  { %v972_v27 = vadd.f32 %v2578_v63, %v923_v14  ;;  %v1180_v51 = vmax.f32 %v1164_v50, 0.0 }
 0x193   :  { %v1156_v16 = vsel %vm666_vm1, %v972_v27, %v2584_v55  ;;  %1196 = vst.msk [vmem:[#allocation10 + $0x68] sm:$0xff] %vm683_vm2, %v1180_v51 }
 0x194   :  { %v1172_v56 = vmax.f32 %v1156_v16, 0.0 }
 0x196   :  { %1188 = vst.msk [vmem:[#allocation10 + $0x28] sm:$0xff] %vm683_vm2, %v1172_v56 }
 0x199   :  { %v945_v36 = vpop.f32.mrf.mxu2 }
 0x19a   :  { %v946_v19 = vadd.f32 %v2589_v23, %v945_v36 }
 0x19c   :  { %v995_v20 = vadd.f32 %v994_v28, %v946_v19  ;;  %v925_v42 = vpop.f32.mrf.mxu0 }
 0x19d   :  { %v926_v13 = vadd.f32 %v2589_v23, %v925_v42 }
 0x19e   :  { %v1165_v63 = vsel %vm666_vm1, %v995_v20, %v1132_v5 }
 0x19f   :  { %v1181_v15 = vmax.f32 %v1165_v63, 0.0  ;;  %v975_v29 = vadd.f32 %v2580_v8, %v926_v13 }
 0x1a1   :  { %1197 = vst.msk [vmem:[#allocation10 + $0x70] sm:$0xff] %vm683_vm2, %v1181_v15  ;;  %v1157_v55 = vsel %vm666_vm1, %v975_v29, %v2591_v34  ;;  %v947_v9 = vpop.f32.mrf.mxu2 }
 0x1a2   :  { %v1173_v52 = vmax.f32 %v1157_v55, 0.0  ;;  %v948_v17 = vadd.f32 %v2589_v23, %v947_v9 }
 0x1a4   :  { %1189 = vst.msk [vmem:[#allocation10 + $0x30] sm:$0xff] %vm683_vm2, %v1173_v52  ;;  %v997_v53 = vadd.f32 %v996_v1, %v948_v17  ;;  %v927_v59 = vpop.f32.mrf.mxu0 }
 0x1a5   :  { %v928_v24 = vadd.f32 %v2589_v23, %v927_v59 }
 0x1a6   :  { %v1166_v37 = vsel %vm666_vm1, %v997_v53, %v1134_v11 }
 0x1a7   :  { %v1182_v8 = vmax.f32 %v1166_v37, 0.0  ;;  %v977_v60 = vadd.f32 %v2582_v41, %v928_v24 }
 0x1a9   :  { %1198 = vst.msk [vmem:[#allocation10 + $0x78] sm:$0xff] %vm683_vm2, %v1182_v8  ;;  %v1158_v34 = vsel %vm666_vm1, %v977_v60, %v2603_v21 }
 0x1aa   :  { %v1174_v0 = vmax.f32 %v1158_v34, 0.0 }
 0x1ac   :  { %1190 = vst.msk [vmem:[#allocation10 + $0x38] sm:$0xff] %vm683_vm2, %v1174_v0 }
 0x1ad   :  { %1211 = dma.vmem_to_hbm [thread:$0]  %s1204_s3, 2048, %s1206_s30, [#allocation4], %s1703_s13, %s1703_s13, %s1704_s14  }
 0x1ae   :  { %1700 = dma.done.wait [#allocation4], 2048  }
 0x1af   :  { %1701 = vsyncadd [#allocation4], 4294965248 }
 0x1b0   :  { %1216 = vsyncpa [#allocation3], 1 }
 0x1b1   :  { %1217 = vsyncpa [#allocation6], 1 }
 0x1b2   :  { %1218 = vsyncpa [#allocation9], 1 }
 0x1b3   :  { %1219 = vsyncpa [#allocation4], 1 }

</bundles_post_ra>
